<compile_context>
chip_gen: v6e
topology: v6e:2x2x1
jax: 0.10.0
libtpu: 0.0.40
codegen_flags: <defaults>
</compile_context>

<pallas_src>
import math

import jax
import jax.numpy as jnp
import numpy as np
from jax import lax
from jax.experimental import pallas as pl
from jax.experimental.pallas import tpu as pltpu


# 3x3 tap offsets in PyTorch kernel order: tap t = ky*3 + kx, offset (ky-1, kx-1)
_TAPS = tuple((ky - 1, kx - 1) for ky in range(3) for kx in range(3))
_GELU_C = math.sqrt(2.0 / math.pi)


def _gelu_tanh(v):
    # TODO(synk): PyTorch nn.GELU() defaults to the exact erf form; the standard
    # tanh approximation is used here for Mosaic-safe lowering (|dev| ~1e-3).
    return 0.5 * v * (1.0 + jnp.tanh(_GELU_C * (v + 0.044715 * v * v * v)))


def cab_pallas(x_nchw, params):
    """CAB forward. x_nchw: (N, C, H, W). params: conv/attention weights."""
    w1, b1, w2, b2, wa1, ba1, wa2, ba2 = params
    n, c, h, w = x_nchw.shape
    p = h * w
    c_mid = w1.shape[1]           # num_feat // compress_ratio
    c_att = wa1.shape[0]          # num_feat // reduction

    # Zero-copy reshape: channels stay on the sublane axis, pixels on the
    # (lane-dense) minor axis. No transpose, no padding, no HBM copy.
    x2 = x_nchw.reshape(n, c, p)

    # Per-tap validity masks over output pixels (compile-time constants):
    # mask[t, pix] == 1  iff  the neighbor (row+oy, col+ox) lies inside the
    # image (this implements the zero padding of a SAME 3x3 conv).
    rows = np.arange(p) // w
    cols = np.arange(p) % w
    masks = jnp.asarray(np.stack([
        ((rows + oy >= 0) & (rows + oy < h) & (cols + ox >= 0) & (cols + ox < w))
        for (oy, ox) in _TAPS
    ]).astype(np.float32))                                   # (9, p)

    def kernel(x_ref, w1_ref, b1_ref, w2_ref, b2_ref,
               wa1_ref, ba1_ref, wa2_ref, ba2_ref, m_ref, o_ref):
        xv = x_ref[0].astype(jnp.float32)                    # (c, p)
        mv = m_ref[...]                                      # (9, p)
        w1v = w1_ref[...].astype(jnp.float32)                # (9, c_mid, c)
        w2v = w2_ref[...].astype(jnp.float32)                # (9, c, c_mid)

        def conv3x3(a, w_taps, n_out):
            # SAME 3x3 conv in (channels, pixels) layout:
            # 9 lane-rolls (XLU) + border masks (VPU) + matmuls (MXU).
            acc = jnp.zeros((n_out, p), jnp.float32)
            for t, (oy, ox) in enumerate(_TAPS):
                s = oy * w + ox
                if oy == 0 and ox == 0:
                    shifted = a
                else:
                    # shifted[:, pix] = a[:, pix + s] (circular), invalid
                    # neighbors zeroed by the border mask.
                    shifted = pltpu.roll(a, shift=(-s) % p, axis=1)
                    shifted = shifted * mv[t:t + 1, :]
                acc = acc + jnp.dot(w_taps[t], shifted,
                                    preferred_element_type=jnp.float32)
            return acc

        # conv1 + GELU
        mid = _gelu_tanh(conv3x3(xv, w1v, c_mid) + b1_ref[...].astype(jnp.float32))
        # conv2
        feat = conv3x3(mid, w2v, c) + b2_ref[...].astype(jnp.float32)   # (c, p)

        # Channel attention: global avg pool -> 1x1 -> ReLU -> 1x1 -> sigmoid.
        pooled = jnp.sum(feat, axis=1, keepdims=True) * (1.0 / p)       # (c, 1)
        a1 = jnp.dot(wa1_ref[...].astype(jnp.float32), pooled,
                     preferred_element_type=jnp.float32)
        a1 = jnp.maximum(a1 + ba1_ref[...].astype(jnp.float32), 0.0)    # (c_att, 1)
        a2 = jnp.dot(wa2_ref[...].astype(jnp.float32), a1,
                     preferred_element_type=jnp.float32)
        a2 = a2 + ba2_ref[...].astype(jnp.float32)                      # (c, 1)
        att = 1.0 / (1.0 + jnp.exp(-a2))                                # sigmoid

        o_ref[0] = (feat * att).astype(o_ref.dtype)

    # Advisory cost so XLA can overlap neighbors with this custom call.
    conv_flops = 2 * n * 9 * p * (c * c_mid) * 2
    att_flops = 2 * n * (c_att * c * 2)
    bytes_acc = 4 * (2 * n * c * p + w1.size + w2.size + b1.size + b2.size +
                     wa1.size + ba1.size + wa2.size + ba2.size + masks.size)
    cost = pl.CostEstimate(flops=conv_flops + att_flops,
                           transcendentals=n * (c_mid * p + c),
                           bytes_accessed=bytes_acc)

    out = pl.pallas_call(
        kernel,
        out_shape=jax.ShapeDtypeStruct((n, c, p), x_nchw.dtype),
        grid_spec=pltpu.PrefetchScalarGridSpec(
            num_scalar_prefetch=0,
            grid=(n,),
            in_specs=[
                pl.BlockSpec((1, c, p), lambda b: (b, 0, 0)),        # x
                pl.BlockSpec((9, c_mid, c), lambda b: (0, 0, 0)),    # w1 taps
                pl.BlockSpec((c_mid, 1), lambda b: (0, 0)),          # b1
                pl.BlockSpec((9, c, c_mid), lambda b: (0, 0, 0)),    # w2 taps
                pl.BlockSpec((c, 1), lambda b: (0, 0)),              # b2
                pl.BlockSpec((c_att, c), lambda b: (0, 0)),          # wa1
                pl.BlockSpec((c_att, 1), lambda b: (0, 0)),          # ba1
                pl.BlockSpec((c, c_att), lambda b: (0, 0)),          # wa2
                pl.BlockSpec((c, 1), lambda b: (0, 0)),              # ba2
                pl.BlockSpec((9, p), lambda b: (0, 0)),              # tap masks
            ],
            out_specs=pl.BlockSpec((1, c, p), lambda b: (b, 0, 0)),
        ),
        compiler_params=pltpu.CompilerParams(
            dimension_semantics=("parallel",),
        ),
        cost_estimate=cost,
    )(x2, w1, b1, w2, b2, wa1, ba1, wa2, ba2, masks)

    return out.reshape(n, c, h, w)      # zero-copy back to NCHW


def cab_reference(x, params):
    """Pure-JAX reference matching the PyTorch CAB forward."""
    w1, b1, w2, b2, wa1, ba1, wa2, ba2 = params
    c_mid, c = w1.shape[1], w1.shape[2]
    w1_oihw = jnp.transpose(w1.reshape(3, 3, c_mid, c), (2, 3, 0, 1))
    w2_oihw = jnp.transpose(w2.reshape(3, 3, c, c_mid), (2, 3, 0, 1))
    dn = ('NCHW', 'OIHW', 'NCHW')
    hcv = lax.conv_general_dilated(x, w1_oihw, (1, 1), ((1, 1), (1, 1)),
                                   dimension_numbers=dn) + b1.reshape(1, -1, 1, 1)
    hcv = _gelu_tanh(hcv)
    hcv = lax.conv_general_dilated(hcv, w2_oihw, (1, 1), ((1, 1), (1, 1)),
                                   dimension_numbers=dn) + b2.reshape(1, -1, 1, 1)
    pooled = jnp.mean(hcv, axis=(2, 3), keepdims=True)
    a = jnp.einsum('oc,ncij->noij', wa1, pooled) + ba1.reshape(1, -1, 1, 1)
    a = jnp.maximum(a, 0.0)
    a = jnp.einsum('oc,ncij->noij', wa2, a) + ba2.reshape(1, -1, 1, 1)
    return hcv * jax.nn.sigmoid(a)


if __name__ == "__main__":
    key = jax.random.PRNGKey(0)
    ks = jax.random.split(key, 9)

    # Small shapes consistent with CAB defaults (compress_ratio=4, reduction=18):
    num_feat, compress_ratio, reduction = 36, 4, 18
    c_mid = num_feat // compress_ratio      # 9
    c_att = num_feat // reduction           # 2
    batch, height, width = 2, 16, 16

    x = jax.random.normal(ks[0], (batch, num_feat, height, width), jnp.float32)
    params = (
        0.1 * jax.random.normal(ks[1], (9, c_mid, num_feat), jnp.float32),   # conv1 taps (t, O, I)
        0.1 * jax.random.normal(ks[2], (c_mid, 1), jnp.float32),             # conv1 bias
        0.1 * jax.random.normal(ks[3], (9, num_feat, c_mid), jnp.float32),   # conv2 taps (t, O, I)
        0.1 * jax.random.normal(ks[4], (num_feat, 1), jnp.float32),          # conv2 bias
        0.1 * jax.random.normal(ks[5], (c_att, num_feat), jnp.float32),      # attn 1x1 #1
        0.1 * jax.random.normal(ks[6], (c_att, 1), jnp.float32),
        0.1 * jax.random.normal(ks[7], (num_feat, c_att), jnp.float32),      # attn 1x1 #2
        0.1 * jax.random.normal(ks[8], (num_feat, 1), jnp.float32),
    )

    y = cab_pallas(x, params)
    y = jax.block_until_ready(y)

    y_ref = cab_reference(x, params)
    assert y.shape == x.shape and y.dtype == x.dtype
    max_err = float(jnp.max(jnp.abs(y - y_ref)))
    # Tolerance accounts for TPU default (bf16-pass) matmul precision in both
    # the kernel and the XLA reference conv; real bugs would be O(1) off.
    assert max_err < 5e-2, f"max abs error vs reference: {max_err}"
    print("KERNEL_OK")
</pallas_src>

<mosaic_0001>
module attributes {stable_mosaic.version = 11 : i64} {
  func.func @kernel(%arg0: i32, %arg1: memref<1x36x256xf32, #tpu.memory_space<vmem>>, %arg2: memref<9x9x36xf32, #tpu.memory_space<vmem>>, %arg3: memref<9x1xf32, #tpu.memory_space<vmem>>, %arg4: memref<9x36x9xf32, #tpu.memory_space<vmem>>, %arg5: memref<36x1xf32, #tpu.memory_space<vmem>>, %arg6: memref<2x36xf32, #tpu.memory_space<vmem>>, %arg7: memref<2x1xf32, #tpu.memory_space<vmem>>, %arg8: memref<36x2xf32, #tpu.memory_space<vmem>>, %arg9: memref<36x1xf32, #tpu.memory_space<vmem>>, %arg10: memref<9x256xf32, #tpu.memory_space<vmem>>, %arg11: memref<1x36x256xf32, #tpu.memory_space<vmem>>) attributes {dimension_semantics = [#tpu.dimension_semantics<parallel>], iteration_bounds = array<i64: 2>, scalar_prefetch = 0 : i64, scratch_operands = 0 : i64, tpu.core_type = #tpu.core_type<tc>, window_params = [{transform_indices = @transform_0, window_bounds = array<i64: 1, 36, 256>}, {pipeline_mode = #tpu.pipeline_mode<synchronous>, transform_indices = @transform_1, window_bounds = array<i64: 9, 9, 36>}, {pipeline_mode = #tpu.pipeline_mode<synchronous>, transform_indices = @transform_2, window_bounds = array<i64: 9, 1>}, {pipeline_mode = #tpu.pipeline_mode<synchronous>, transform_indices = @transform_3, window_bounds = array<i64: 9, 36, 9>}, {pipeline_mode = #tpu.pipeline_mode<synchronous>, transform_indices = @transform_4, window_bounds = array<i64: 36, 1>}, {pipeline_mode = #tpu.pipeline_mode<synchronous>, transform_indices = @transform_5, window_bounds = array<i64: 2, 36>}, {pipeline_mode = #tpu.pipeline_mode<synchronous>, transform_indices = @transform_6, window_bounds = array<i64: 2, 1>}, {pipeline_mode = #tpu.pipeline_mode<synchronous>, transform_indices = @transform_7, window_bounds = array<i64: 36, 2>}, {pipeline_mode = #tpu.pipeline_mode<synchronous>, transform_indices = @transform_8, window_bounds = array<i64: 36, 1>}, {pipeline_mode = #tpu.pipeline_mode<synchronous>, transform_indices = @transform_9, window_bounds = array<i64: 9, 256>}, {transform_indices = @transform_10, window_bounds = array<i64: 1, 36, 256>}]} {
    %c0 = arith.constant 0 : index
    %c0_0 = arith.constant 0 : index
    %c0_1 = arith.constant 0 : index
    %0 = vector.load %arg1[%c0, %c0_0, %c0_1] : memref<1x36x256xf32, #tpu.memory_space<vmem>>, vector<1x36x256xf32>
    %1 = vector.shape_cast %0 : vector<1x36x256xf32> to vector<36x256xf32>
    %c0_2 = arith.constant 0 : index
    %c0_3 = arith.constant 0 : index
    %2 = vector.load %arg10[%c0_2, %c0_3] : memref<9x256xf32, #tpu.memory_space<vmem>>, vector<9x256xf32>
    %c0_4 = arith.constant 0 : index
    %c0_5 = arith.constant 0 : index
    %c0_6 = arith.constant 0 : index
    %3 = vector.load %arg2[%c0_4, %c0_5, %c0_6] : memref<9x9x36xf32, #tpu.memory_space<vmem>>, vector<9x9x36xf32>
    %c0_7 = arith.constant 0 : index
    %c0_8 = arith.constant 0 : index
    %c0_9 = arith.constant 0 : index
    %4 = vector.load %arg4[%c0_7, %c0_8, %c0_9] : memref<9x36x9xf32, #tpu.memory_space<vmem>>, vector<9x36x9xf32>
    %cst = arith.constant 0.000000e+00 : f32
    %5 = vector.broadcast %cst : f32 to vector<9x256xf32>
    %c17_i32 = arith.constant 17 : i32
    %6 = tpu.dynamic_rotate %1 by %c17_i32 dim 1 : vector<36x256xf32>, i32 -> vector<36x256xf32>
    %7 = vector.extract_strided_slice %2 {offsets = [0, 0], sizes = [1, 256], strides = [1, 1]} : vector<9x256xf32> to vector<1x256xf32>
    %8 = vector.broadcast %7 : vector<1x256xf32> to vector<36x256xf32>
    %9 = arith.mulf %6, %8 : vector<36x256xf32>
    %10 = vector.extract_strided_slice %3 {offsets = [0, 0, 0], sizes = [1, 9, 36], strides = [1, 1, 1]} : vector<9x9x36xf32> to vector<1x9x36xf32>
    %11 = vector.shape_cast %10 : vector<1x9x36xf32> to vector<9x36xf32>
    %cst_10 = arith.constant dense<0.000000e+00> : vector<9x256xf32>
    %12 = tpu.matmul %11, %9, %cst_10 {dimension_numbers = #tpu.dot_dimension_numbers<[1], [0], [0], [1], [0, 0, 1, 1], [], []>} : vector<9x36xf32>, vector<36x256xf32>, vector<9x256xf32> -> vector<9x256xf32>
    %13 = arith.addf %5, %12 : vector<9x256xf32>
    %c16_i32 = arith.constant 16 : i32
    %14 = tpu.dynamic_rotate %1 by %c16_i32 dim 1 : vector<36x256xf32>, i32 -> vector<36x256xf32>
    %15 = vector.extract_strided_slice %2 {offsets = [1, 0], sizes = [1, 256], strides = [1, 1]} : vector<9x256xf32> to vector<1x256xf32>
    %16 = vector.broadcast %15 : vector<1x256xf32> to vector<36x256xf32>
    %17 = arith.mulf %14, %16 : vector<36x256xf32>
    %18 = vector.extract_strided_slice %3 {offsets = [1, 0, 0], sizes = [1, 9, 36], strides = [1, 1, 1]} : vector<9x9x36xf32> to vector<1x9x36xf32>
    %19 = vector.shape_cast %18 : vector<1x9x36xf32> to vector<9x36xf32>
    %cst_11 = arith.constant dense<0.000000e+00> : vector<9x256xf32>
    %20 = tpu.matmul %19, %17, %cst_11 {dimension_numbers = #tpu.dot_dimension_numbers<[1], [0], [0], [1], [0, 0, 1, 1], [], []>} : vector<9x36xf32>, vector<36x256xf32>, vector<9x256xf32> -> vector<9x256xf32>
    %21 = arith.addf %13, %20 : vector<9x256xf32>
    %c15_i32 = arith.constant 15 : i32
    %22 = tpu.dynamic_rotate %1 by %c15_i32 dim 1 : vector<36x256xf32>, i32 -> vector<36x256xf32>
    %23 = vector.extract_strided_slice %2 {offsets = [2, 0], sizes = [1, 256], strides = [1, 1]} : vector<9x256xf32> to vector<1x256xf32>
    %24 = vector.broadcast %23 : vector<1x256xf32> to vector<36x256xf32>
    %25 = arith.mulf %22, %24 : vector<36x256xf32>
    %26 = vector.extract_strided_slice %3 {offsets = [2, 0, 0], sizes = [1, 9, 36], strides = [1, 1, 1]} : vector<9x9x36xf32> to vector<1x9x36xf32>
    %27 = vector.shape_cast %26 : vector<1x9x36xf32> to vector<9x36xf32>
    %cst_12 = arith.constant dense<0.000000e+00> : vector<9x256xf32>
    %28 = tpu.matmul %27, %25, %cst_12 {dimension_numbers = #tpu.dot_dimension_numbers<[1], [0], [0], [1], [0, 0, 1, 1], [], []>} : vector<9x36xf32>, vector<36x256xf32>, vector<9x256xf32> -> vector<9x256xf32>
    %29 = arith.addf %21, %28 : vector<9x256xf32>
    %c1_i32 = arith.constant 1 : i32
    %30 = tpu.dynamic_rotate %1 by %c1_i32 dim 1 : vector<36x256xf32>, i32 -> vector<36x256xf32>
    %31 = vector.extract_strided_slice %2 {offsets = [3, 0], sizes = [1, 256], strides = [1, 1]} : vector<9x256xf32> to vector<1x256xf32>
    %32 = vector.broadcast %31 : vector<1x256xf32> to vector<36x256xf32>
    %33 = arith.mulf %30, %32 : vector<36x256xf32>
    %34 = vector.extract_strided_slice %3 {offsets = [3, 0, 0], sizes = [1, 9, 36], strides = [1, 1, 1]} : vector<9x9x36xf32> to vector<1x9x36xf32>
    %35 = vector.shape_cast %34 : vector<1x9x36xf32> to vector<9x36xf32>
    %cst_13 = arith.constant dense<0.000000e+00> : vector<9x256xf32>
    %36 = tpu.matmul %35, %33, %cst_13 {dimension_numbers = #tpu.dot_dimension_numbers<[1], [0], [0], [1], [0, 0, 1, 1], [], []>} : vector<9x36xf32>, vector<36x256xf32>, vector<9x256xf32> -> vector<9x256xf32>
    %37 = arith.addf %29, %36 : vector<9x256xf32>
    %38 = vector.extract_strided_slice %3 {offsets = [4, 0, 0], sizes = [1, 9, 36], strides = [1, 1, 1]} : vector<9x9x36xf32> to vector<1x9x36xf32>
    %39 = vector.shape_cast %38 : vector<1x9x36xf32> to vector<9x36xf32>
    %cst_14 = arith.constant dense<0.000000e+00> : vector<9x256xf32>
    %40 = tpu.matmul %39, %1, %cst_14 {dimension_numbers = #tpu.dot_dimension_numbers<[1], [0], [0], [1], [0, 0, 1, 1], [], []>} : vector<9x36xf32>, vector<36x256xf32>, vector<9x256xf32> -> vector<9x256xf32>
    %41 = arith.addf %37, %40 : vector<9x256xf32>
    %c255_i32 = arith.constant 255 : i32
    %42 = tpu.dynamic_rotate %1 by %c255_i32 dim 1 : vector<36x256xf32>, i32 -> vector<36x256xf32>
    %43 = vector.extract_strided_slice %2 {offsets = [5, 0], sizes = [1, 256], strides = [1, 1]} : vector<9x256xf32> to vector<1x256xf32>
    %44 = vector.broadcast %43 : vector<1x256xf32> to vector<36x256xf32>
    %45 = arith.mulf %42, %44 : vector<36x256xf32>
    %46 = vector.extract_strided_slice %3 {offsets = [5, 0, 0], sizes = [1, 9, 36], strides = [1, 1, 1]} : vector<9x9x36xf32> to vector<1x9x36xf32>
    %47 = vector.shape_cast %46 : vector<1x9x36xf32> to vector<9x36xf32>
    %cst_15 = arith.constant dense<0.000000e+00> : vector<9x256xf32>
    %48 = tpu.matmul %47, %45, %cst_15 {dimension_numbers = #tpu.dot_dimension_numbers<[1], [0], [0], [1], [0, 0, 1, 1], [], []>} : vector<9x36xf32>, vector<36x256xf32>, vector<9x256xf32> -> vector<9x256xf32>
    %49 = arith.addf %41, %48 : vector<9x256xf32>
    %c241_i32 = arith.constant 241 : i32
    %50 = tpu.dynamic_rotate %1 by %c241_i32 dim 1 : vector<36x256xf32>, i32 -> vector<36x256xf32>
    %51 = vector.extract_strided_slice %2 {offsets = [6, 0], sizes = [1, 256], strides = [1, 1]} : vector<9x256xf32> to vector<1x256xf32>
    %52 = vector.broadcast %51 : vector<1x256xf32> to vector<36x256xf32>
    %53 = arith.mulf %50, %52 : vector<36x256xf32>
    %54 = vector.extract_strided_slice %3 {offsets = [6, 0, 0], sizes = [1, 9, 36], strides = [1, 1, 1]} : vector<9x9x36xf32> to vector<1x9x36xf32>
    %55 = vector.shape_cast %54 : vector<1x9x36xf32> to vector<9x36xf32>
    %cst_16 = arith.constant dense<0.000000e+00> : vector<9x256xf32>
    %56 = tpu.matmul %55, %53, %cst_16 {dimension_numbers = #tpu.dot_dimension_numbers<[1], [0], [0], [1], [0, 0, 1, 1], [], []>} : vector<9x36xf32>, vector<36x256xf32>, vector<9x256xf32> -> vector<9x256xf32>
    %57 = arith.addf %49, %56 : vector<9x256xf32>
    %c240_i32 = arith.constant 240 : i32
    %58 = tpu.dynamic_rotate %1 by %c240_i32 dim 1 : vector<36x256xf32>, i32 -> vector<36x256xf32>
    %59 = vector.extract_strided_slice %2 {offsets = [7, 0], sizes = [1, 256], strides = [1, 1]} : vector<9x256xf32> to vector<1x256xf32>
    %60 = vector.broadcast %59 : vector<1x256xf32> to vector<36x256xf32>
    %61 = arith.mulf %58, %60 : vector<36x256xf32>
    %62 = vector.extract_strided_slice %3 {offsets = [7, 0, 0], sizes = [1, 9, 36], strides = [1, 1, 1]} : vector<9x9x36xf32> to vector<1x9x36xf32>
    %63 = vector.shape_cast %62 : vector<1x9x36xf32> to vector<9x36xf32>
    %cst_17 = arith.constant dense<0.000000e+00> : vector<9x256xf32>
    %64 = tpu.matmul %63, %61, %cst_17 {dimension_numbers = #tpu.dot_dimension_numbers<[1], [0], [0], [1], [0, 0, 1, 1], [], []>} : vector<9x36xf32>, vector<36x256xf32>, vector<9x256xf32> -> vector<9x256xf32>
    %65 = arith.addf %57, %64 : vector<9x256xf32>
    %c239_i32 = arith.constant 239 : i32
    %66 = tpu.dynamic_rotate %1 by %c239_i32 dim 1 : vector<36x256xf32>, i32 -> vector<36x256xf32>
    %67 = vector.extract_strided_slice %2 {offsets = [8, 0], sizes = [1, 256], strides = [1, 1]} : vector<9x256xf32> to vector<1x256xf32>
    %68 = vector.broadcast %67 : vector<1x256xf32> to vector<36x256xf32>
    %69 = arith.mulf %66, %68 : vector<36x256xf32>
    %70 = vector.extract_strided_slice %3 {offsets = [8, 0, 0], sizes = [1, 9, 36], strides = [1, 1, 1]} : vector<9x9x36xf32> to vector<1x9x36xf32>
    %71 = vector.shape_cast %70 : vector<1x9x36xf32> to vector<9x36xf32>
    %cst_18 = arith.constant dense<0.000000e+00> : vector<9x256xf32>
    %72 = tpu.matmul %71, %69, %cst_18 {dimension_numbers = #tpu.dot_dimension_numbers<[1], [0], [0], [1], [0, 0, 1, 1], [], []>} : vector<9x36xf32>, vector<36x256xf32>, vector<9x256xf32> -> vector<9x256xf32>
    %73 = arith.addf %65, %72 : vector<9x256xf32>
    %c0_19 = arith.constant 0 : index
    %c0_20 = arith.constant 0 : index
    %74 = vector.load %arg3[%c0_19, %c0_20] : memref<9x1xf32, #tpu.memory_space<vmem>>, vector<9x1xf32>
    %75 = vector.broadcast %74 : vector<9x1xf32> to vector<9x256xf32>
    %76 = arith.addf %73, %75 : vector<9x256xf32>
    %cst_21 = arith.constant 5.000000e-01 : f32
    %77 = vector.broadcast %cst_21 : f32 to vector<9x256xf32>
    %78 = arith.mulf %77, %76 : vector<9x256xf32>
    %cst_22 = arith.constant 4.471500e-02 : f32
    %79 = vector.broadcast %cst_22 : f32 to vector<9x256xf32>
    %80 = arith.mulf %79, %76 : vector<9x256xf32>
    %81 = arith.mulf %80, %76 : vector<9x256xf32>
    %82 = arith.mulf %81, %76 : vector<9x256xf32>
    %83 = arith.addf %76, %82 : vector<9x256xf32>
    %cst_23 = arith.constant 0.797884583 : f32
    %84 = vector.broadcast %cst_23 : f32 to vector<9x256xf32>
    %85 = arith.mulf %84, %83 : vector<9x256xf32>
    %86 = math.tanh %85 : vector<9x256xf32>
    %cst_24 = arith.constant 1.000000e+00 : f32
    %87 = vector.broadcast %cst_24 : f32 to vector<9x256xf32>
    %88 = arith.addf %87, %86 : vector<9x256xf32>
    %89 = arith.mulf %78, %88 : vector<9x256xf32>
    %cst_25 = arith.constant 0.000000e+00 : f32
    %90 = vector.broadcast %cst_25 : f32 to vector<36x256xf32>
    %c17_i32_26 = arith.constant 17 : i32
    %91 = tpu.dynamic_rotate %89 by %c17_i32_26 dim 1 : vector<9x256xf32>, i32 -> vector<9x256xf32>
    %92 = vector.extract_strided_slice %2 {offsets = [0, 0], sizes = [1, 256], strides = [1, 1]} : vector<9x256xf32> to vector<1x256xf32>
    %93 = vector.broadcast %92 : vector<1x256xf32> to vector<9x256xf32>
    %94 = arith.mulf %91, %93 : vector<9x256xf32>
    %95 = vector.extract_strided_slice %4 {offsets = [0, 0, 0], sizes = [1, 36, 9], strides = [1, 1, 1]} : vector<9x36x9xf32> to vector<1x36x9xf32>
    %96 = vector.shape_cast %95 : vector<1x36x9xf32> to vector<36x9xf32>
    %cst_27 = arith.constant dense<0.000000e+00> : vector<36x256xf32>
    %97 = tpu.matmul %96, %94, %cst_27 {dimension_numbers = #tpu.dot_dimension_numbers<[1], [0], [0], [1], [0, 0, 1, 1], [], []>} : vector<36x9xf32>, vector<9x256xf32>, vector<36x256xf32> -> vector<36x256xf32>
    %98 = arith.addf %90, %97 : vector<36x256xf32>
    %c16_i32_28 = arith.constant 16 : i32
    %99 = tpu.dynamic_rotate %89 by %c16_i32_28 dim 1 : vector<9x256xf32>, i32 -> vector<9x256xf32>
    %100 = vector.extract_strided_slice %2 {offsets = [1, 0], sizes = [1, 256], strides = [1, 1]} : vector<9x256xf32> to vector<1x256xf32>
    %101 = vector.broadcast %100 : vector<1x256xf32> to vector<9x256xf32>
    %102 = arith.mulf %99, %101 : vector<9x256xf32>
    %103 = vector.extract_strided_slice %4 {offsets = [1, 0, 0], sizes = [1, 36, 9], strides = [1, 1, 1]} : vector<9x36x9xf32> to vector<1x36x9xf32>
    %104 = vector.shape_cast %103 : vector<1x36x9xf32> to vector<36x9xf32>
    %cst_29 = arith.constant dense<0.000000e+00> : vector<36x256xf32>
    %105 = tpu.matmul %104, %102, %cst_29 {dimension_numbers = #tpu.dot_dimension_numbers<[1], [0], [0], [1], [0, 0, 1, 1], [], []>} : vector<36x9xf32>, vector<9x256xf32>, vector<36x256xf32> -> vector<36x256xf32>
    %106 = arith.addf %98, %105 : vector<36x256xf32>
    %c15_i32_30 = arith.constant 15 : i32
    %107 = tpu.dynamic_rotate %89 by %c15_i32_30 dim 1 : vector<9x256xf32>, i32 -> vector<9x256xf32>
    %108 = vector.extract_strided_slice %2 {offsets = [2, 0], sizes = [1, 256], strides = [1, 1]} : vector<9x256xf32> to vector<1x256xf32>
    %109 = vector.broadcast %108 : vector<1x256xf32> to vector<9x256xf32>
    %110 = arith.mulf %107, %109 : vector<9x256xf32>
    %111 = vector.extract_strided_slice %4 {offsets = [2, 0, 0], sizes = [1, 36, 9], strides = [1, 1, 1]} : vector<9x36x9xf32> to vector<1x36x9xf32>
    %112 = vector.shape_cast %111 : vector<1x36x9xf32> to vector<36x9xf32>
    %cst_31 = arith.constant dense<0.000000e+00> : vector<36x256xf32>
    %113 = tpu.matmul %112, %110, %cst_31 {dimension_numbers = #tpu.dot_dimension_numbers<[1], [0], [0], [1], [0, 0, 1, 1], [], []>} : vector<36x9xf32>, vector<9x256xf32>, vector<36x256xf32> -> vector<36x256xf32>
    %114 = arith.addf %106, %113 : vector<36x256xf32>
    %c1_i32_32 = arith.constant 1 : i32
    %115 = tpu.dynamic_rotate %89 by %c1_i32_32 dim 1 : vector<9x256xf32>, i32 -> vector<9x256xf32>
    %116 = vector.extract_strided_slice %2 {offsets = [3, 0], sizes = [1, 256], strides = [1, 1]} : vector<9x256xf32> to vector<1x256xf32>
    %117 = vector.broadcast %116 : vector<1x256xf32> to vector<9x256xf32>
    %118 = arith.mulf %115, %117 : vector<9x256xf32>
    %119 = vector.extract_strided_slice %4 {offsets = [3, 0, 0], sizes = [1, 36, 9], strides = [1, 1, 1]} : vector<9x36x9xf32> to vector<1x36x9xf32>
    %120 = vector.shape_cast %119 : vector<1x36x9xf32> to vector<36x9xf32>
    %cst_33 = arith.constant dense<0.000000e+00> : vector<36x256xf32>
    %121 = tpu.matmul %120, %118, %cst_33 {dimension_numbers = #tpu.dot_dimension_numbers<[1], [0], [0], [1], [0, 0, 1, 1], [], []>} : vector<36x9xf32>, vector<9x256xf32>, vector<36x256xf32> -> vector<36x256xf32>
    %122 = arith.addf %114, %121 : vector<36x256xf32>
    %123 = vector.extract_strided_slice %4 {offsets = [4, 0, 0], sizes = [1, 36, 9], strides = [1, 1, 1]} : vector<9x36x9xf32> to vector<1x36x9xf32>
    %124 = vector.shape_cast %123 : vector<1x36x9xf32> to vector<36x9xf32>
    %cst_34 = arith.constant dense<0.000000e+00> : vector<36x256xf32>
    %125 = tpu.matmul %124, %89, %cst_34 {dimension_numbers = #tpu.dot_dimension_numbers<[1], [0], [0], [1], [0, 0, 1, 1], [], []>} : vector<36x9xf32>, vector<9x256xf32>, vector<36x256xf32> -> vector<36x256xf32>
    %126 = arith.addf %122, %125 : vector<36x256xf32>
    %c255_i32_35 = arith.constant 255 : i32
    %127 = tpu.dynamic_rotate %89 by %c255_i32_35 dim 1 : vector<9x256xf32>, i32 -> vector<9x256xf32>
    %128 = vector.extract_strided_slice %2 {offsets = [5, 0], sizes = [1, 256], strides = [1, 1]} : vector<9x256xf32> to vector<1x256xf32>
    %129 = vector.broadcast %128 : vector<1x256xf32> to vector<9x256xf32>
    %130 = arith.mulf %127, %129 : vector<9x256xf32>
    %131 = vector.extract_strided_slice %4 {offsets = [5, 0, 0], sizes = [1, 36, 9], strides = [1, 1, 1]} : vector<9x36x9xf32> to vector<1x36x9xf32>
    %132 = vector.shape_cast %131 : vector<1x36x9xf32> to vector<36x9xf32>
    %cst_36 = arith.constant dense<0.000000e+00> : vector<36x256xf32>
    %133 = tpu.matmul %132, %130, %cst_36 {dimension_numbers = #tpu.dot_dimension_numbers<[1], [0], [0], [1], [0, 0, 1, 1], [], []>} : vector<36x9xf32>, vector<9x256xf32>, vector<36x256xf32> -> vector<36x256xf32>
    %134 = arith.addf %126, %133 : vector<36x256xf32>
    %c241_i32_37 = arith.constant 241 : i32
    %135 = tpu.dynamic_rotate %89 by %c241_i32_37 dim 1 : vector<9x256xf32>, i32 -> vector<9x256xf32>
    %136 = vector.extract_strided_slice %2 {offsets = [6, 0], sizes = [1, 256], strides = [1, 1]} : vector<9x256xf32> to vector<1x256xf32>
    %137 = vector.broadcast %136 : vector<1x256xf32> to vector<9x256xf32>
    %138 = arith.mulf %135, %137 : vector<9x256xf32>
    %139 = vector.extract_strided_slice %4 {offsets = [6, 0, 0], sizes = [1, 36, 9], strides = [1, 1, 1]} : vector<9x36x9xf32> to vector<1x36x9xf32>
    %140 = vector.shape_cast %139 : vector<1x36x9xf32> to vector<36x9xf32>
    %cst_38 = arith.constant dense<0.000000e+00> : vector<36x256xf32>
    %141 = tpu.matmul %140, %138, %cst_38 {dimension_numbers = #tpu.dot_dimension_numbers<[1], [0], [0], [1], [0, 0, 1, 1], [], []>} : vector<36x9xf32>, vector<9x256xf32>, vector<36x256xf32> -> vector<36x256xf32>
    %142 = arith.addf %134, %141 : vector<36x256xf32>
    %c240_i32_39 = arith.constant 240 : i32
    %143 = tpu.dynamic_rotate %89 by %c240_i32_39 dim 1 : vector<9x256xf32>, i32 -> vector<9x256xf32>
    %144 = vector.extract_strided_slice %2 {offsets = [7, 0], sizes = [1, 256], strides = [1, 1]} : vector<9x256xf32> to vector<1x256xf32>
    %145 = vector.broadcast %144 : vector<1x256xf32> to vector<9x256xf32>
    %146 = arith.mulf %143, %145 : vector<9x256xf32>
    %147 = vector.extract_strided_slice %4 {offsets = [7, 0, 0], sizes = [1, 36, 9], strides = [1, 1, 1]} : vector<9x36x9xf32> to vector<1x36x9xf32>
    %148 = vector.shape_cast %147 : vector<1x36x9xf32> to vector<36x9xf32>
    %cst_40 = arith.constant dense<0.000000e+00> : vector<36x256xf32>
    %149 = tpu.matmul %148, %146, %cst_40 {dimension_numbers = #tpu.dot_dimension_numbers<[1], [0], [0], [1], [0, 0, 1, 1], [], []>} : vector<36x9xf32>, vector<9x256xf32>, vector<36x256xf32> -> vector<36x256xf32>
    %150 = arith.addf %142, %149 : vector<36x256xf32>
    %c239_i32_41 = arith.constant 239 : i32
    %151 = tpu.dynamic_rotate %89 by %c239_i32_41 dim 1 : vector<9x256xf32>, i32 -> vector<9x256xf32>
    %152 = vector.extract_strided_slice %2 {offsets = [8, 0], sizes = [1, 256], strides = [1, 1]} : vector<9x256xf32> to vector<1x256xf32>
    %153 = vector.broadcast %152 : vector<1x256xf32> to vector<9x256xf32>
    %154 = arith.mulf %151, %153 : vector<9x256xf32>
    %155 = vector.extract_strided_slice %4 {offsets = [8, 0, 0], sizes = [1, 36, 9], strides = [1, 1, 1]} : vector<9x36x9xf32> to vector<1x36x9xf32>
    %156 = vector.shape_cast %155 : vector<1x36x9xf32> to vector<36x9xf32>
    %cst_42 = arith.constant dense<0.000000e+00> : vector<36x256xf32>
    %157 = tpu.matmul %156, %154, %cst_42 {dimension_numbers = #tpu.dot_dimension_numbers<[1], [0], [0], [1], [0, 0, 1, 1], [], []>} : vector<36x9xf32>, vector<9x256xf32>, vector<36x256xf32> -> vector<36x256xf32>
    %158 = arith.addf %150, %157 : vector<36x256xf32>
    %c0_43 = arith.constant 0 : index
    %c0_44 = arith.constant 0 : index
    %159 = vector.load %arg5[%c0_43, %c0_44] : memref<36x1xf32, #tpu.memory_space<vmem>>, vector<36x1xf32>
    %160 = vector.broadcast %159 : vector<36x1xf32> to vector<36x256xf32>
    %161 = arith.addf %158, %160 : vector<36x256xf32>
    %cst_45 = arith.constant dense<0.000000e+00> : vector<36xf32>
    %162 = vector.multi_reduction <add>, %161, %cst_45 [1] : vector<36x256xf32> to vector<36xf32>
    %163 = vector.shape_cast %162 : vector<36xf32> to vector<36x1xf32>
    %cst_46 = arith.constant 3.906250e-03 : f32
    %164 = vector.broadcast %cst_46 : f32 to vector<36x1xf32>
    %165 = arith.mulf %163, %164 : vector<36x1xf32>
    %c0_47 = arith.constant 0 : index
    %c0_48 = arith.constant 0 : index
    %166 = vector.load %arg6[%c0_47, %c0_48] : memref<2x36xf32, #tpu.memory_space<vmem>>, vector<2x36xf32>
    %cst_49 = arith.constant dense<0.000000e+00> : vector<2x1xf32>
    %167 = tpu.matmul %166, %165, %cst_49 {dimension_numbers = #tpu.dot_dimension_numbers<[1], [0], [0], [1], [0, 0, 1, 1], [], []>} : vector<2x36xf32>, vector<36x1xf32>, vector<2x1xf32> -> vector<2x1xf32>
    %c0_50 = arith.constant 0 : index
    %c0_51 = arith.constant 0 : index
    %168 = vector.load %arg7[%c0_50, %c0_51] : memref<2x1xf32, #tpu.memory_space<vmem>>, vector<2x1xf32>
    %169 = arith.addf %167, %168 : vector<2x1xf32>
    %cst_52 = arith.constant 0.000000e+00 : f32
    %170 = vector.broadcast %cst_52 : f32 to vector<2x1xf32>
    %171 = arith.maximumf %169, %170 : vector<2x1xf32>
    %c0_53 = arith.constant 0 : index
    %c0_54 = arith.constant 0 : index
    %172 = vector.load %arg8[%c0_53, %c0_54] : memref<36x2xf32, #tpu.memory_space<vmem>>, vector<36x2xf32>
    %cst_55 = arith.constant dense<0.000000e+00> : vector<36x1xf32>
    %173 = tpu.matmul %172, %171, %cst_55 {dimension_numbers = #tpu.dot_dimension_numbers<[1], [0], [0], [1], [0, 0, 1, 1], [], []>} : vector<36x2xf32>, vector<2x1xf32>, vector<36x1xf32> -> vector<36x1xf32>
    %c0_56 = arith.constant 0 : index
    %c0_57 = arith.constant 0 : index
    %174 = vector.load %arg9[%c0_56, %c0_57] : memref<36x1xf32, #tpu.memory_space<vmem>>, vector<36x1xf32>
    %175 = arith.addf %173, %174 : vector<36x1xf32>
    %cst_58 = arith.constant 0.000000e+00 : f32
    %176 = vector.broadcast %cst_58 : f32 to vector<36x1xf32>
    %177 = arith.subf %176, %175 : vector<36x1xf32>
    %178 = math.exp %177 : vector<36x1xf32>
    %cst_59 = arith.constant 1.000000e+00 : f32
    %179 = vector.broadcast %cst_59 : f32 to vector<36x1xf32>
    %180 = arith.addf %179, %178 : vector<36x1xf32>
    %cst_60 = arith.constant 1.000000e+00 : f32
    %181 = vector.broadcast %cst_60 : f32 to vector<36x1xf32>
    %182 = arith.divf %181, %180 : vector<36x1xf32>
    %183 = vector.broadcast %182 : vector<36x1xf32> to vector<36x256xf32>
    %184 = arith.mulf %161, %183 : vector<36x256xf32>
    %c0_61 = arith.constant 0 : index
    %c0_62 = arith.constant 0 : index
    %c0_63 = arith.constant 0 : index
    %185 = vector.load %arg11[%c0_61, %c0_62, %c0_63] : memref<1x36x256xf32, #tpu.memory_space<vmem>>, vector<1x36x256xf32>
    %186 = vector.shape_cast %185 : vector<1x36x256xf32> to vector<36x256xf32>
    %187 = vector.shape_cast %184 : vector<36x256xf32> to vector<1x36x256xf32>
    tpu.vector_store %arg11[%c0_61, %c0_62, %c0_63], %187 {strides = array<i32>} : memref<1x36x256xf32, #tpu.memory_space<vmem>>, vector<1x36x256xf32>,
    return
  }
  func.func @transform_0(%arg0: i32) -> (i32, i32, i32) {
    %c0_i32 = arith.constant 0 : i32
    %c0_i32_0 = arith.constant 0 : i32
    %c0_i32_1 = arith.constant 0 : i32
    return %arg0, %c0_i32, %c0_i32_0 : i32, i32, i32
  }
  func.func @transform_1(%arg0: i32) -> (i32, i32, i32) {
    %c0_i32 = arith.constant 0 : i32
    %c0_i32_0 = arith.constant 0 : i32
    %c0_i32_1 = arith.constant 0 : i32
    %c0_i32_2 = arith.constant 0 : i32
    return %c0_i32, %c0_i32_0, %c0_i32_1 : i32, i32, i32
  }
  func.func @transform_2(%arg0: i32) -> (i32, i32) {
    %c0_i32 = arith.constant 0 : i32
    %c0_i32_0 = arith.constant 0 : i32
    %c0_i32_1 = arith.constant 0 : i32
    return %c0_i32, %c0_i32_0 : i32, i32
  }
  func.func @transform_3(%arg0: i32) -> (i32, i32, i32) {
    %c0_i32 = arith.constant 0 : i32
    %c0_i32_0 = arith.constant 0 : i32
    %c0_i32_1 = arith.constant 0 : i32
    %c0_i32_2 = arith.constant 0 : i32
    return %c0_i32, %c0_i32_0, %c0_i32_1 : i32, i32, i32
  }
  func.func @transform_4(%arg0: i32) -> (i32, i32) {
    %c0_i32 = arith.constant 0 : i32
    %c0_i32_0 = arith.constant 0 : i32
    %c0_i32_1 = arith.constant 0 : i32
    return %c0_i32, %c0_i32_0 : i32, i32
  }
  func.func @transform_5(%arg0: i32) -> (i32, i32) {
    %c0_i32 = arith.constant 0 : i32
    %c0_i32_0 = arith.constant 0 : i32
    %c0_i32_1 = arith.constant 0 : i32
    return %c0_i32, %c0_i32_0 : i32, i32
  }
  func.func @transform_6(%arg0: i32) -> (i32, i32) {
    %c0_i32 = arith.constant 0 : i32
    %c0_i32_0 = arith.constant 0 : i32
    %c0_i32_1 = arith.constant 0 : i32
    return %c0_i32, %c0_i32_0 : i32, i32
  }
  func.func @transform_7(%arg0: i32) -> (i32, i32) {
    %c0_i32 = arith.constant 0 : i32
    %c0_i32_0 = arith.constant 0 : i32
    %c0_i32_1 = arith.constant 0 : i32
    return %c0_i32, %c0_i32_0 : i32, i32
  }
  func.func @transform_8(%arg0: i32) -> (i32, i32) {
    %c0_i32 = arith.constant 0 : i32
    %c0_i32_0 = arith.constant 0 : i32
    %c0_i32_1 = arith.constant 0 : i32
    return %c0_i32, %c0_i32_0 : i32, i32
  }
  func.func @transform_9(%arg0: i32) -> (i32, i32) {
    %c0_i32 = arith.constant 0 : i32
    %c0_i32_0 = arith.constant 0 : i32
    %c0_i32_1 = arith.constant 0 : i32
    return %c0_i32, %c0_i32_0 : i32, i32
  }
  func.func @transform_10(%arg0: i32) -> (i32, i32, i32) {
    %c0_i32 = arith.constant 0 : i32
    %c0_i32_0 = arith.constant 0 : i32
    %c0_i32_1 = arith.constant 0 : i32
    return %arg0, %c0_i32, %c0_i32_0 : i32, i32, i32
  }
}

</mosaic_0001>

<bundles_post_ra>
// kernel: tpu_custom_call.1
= control target key start
LH: loop header
LB: loop body
LE: loop exit
PB: predicated region body
PF: predicated region fallthrough
CT: control target
= control target key end

     0   :  { %s3637_s13 = smov 0   ;;  %s4931_s0 = inlined_call_operand.vmem [shape: f32[2,36,256], index: 0, kind: input, shape index: {}]   ;;  %s4932_s1 = inlined_call_operand.vmem [shape: f32[9,9,36], index: 1, kind: input, shape index: {}]   ;;  %s4933_s2 = inlined_call_operand.vmem [shape: f32[9,1], index: 2, kind: input, shape index: {}]   ;;  %s4934_s3 = inlined_call_operand.vmem [shape: f32[9,36,9], index: 3, kind: input, shape index: {}]   ;;  %s4935_s4 = inlined_call_operand.vmem [shape: f32[36,1], index: 4, kind: input, shape index: {}]   ;;  %s4936_s5 = inlined_call_operand.vmem [shape: f32[2,36], index: 5, kind: input, shape index: {}]   ;;  %s4937_s6 = inlined_call_operand.vmem [shape: f32[2,1], index: 6, kind: input, shape index: {}]   ;;  %s4938_s7 = inlined_call_operand.vmem [shape: f32[36,2], index: 7, kind: input, shape index: {}]   ;;  %s4939_s8 = inlined_call_operand.vmem [shape: f32[36,1], index: 8, kind: input, shape index: {}]   ;;  %s4940_s9 = inlined_call_operand.vmem [shape: f32[9,256], index: 9, kind: input, shape index: {}]   ;;  %s4941_s10 = inlined_call_operand.vmem [shape: f32[2,36,256], index: 10, kind: output, shape index: {}]  }
   0x1 LB: > { %s3349_s14 = sadd.s32 4294967295, %s3569_s13   ;;  %p3353_p0 = scmp.ge.s32.totalorder %s3569_s13, 1  ;;  %s3569_s13 = sphi %s3637_s13, %s20_s13  }
   0x2   : > { %p312_p1 = scmp.lt.s32.totalorder %s3569_s13, 3 }
   0x4   : > { %p313_p2 = pnand %p3353_p0, %p312_p1 }
   0x6   : > { %316 = sbr.rel (%p313_p2) target bundleno = 1680 (0x690), region = 60 }
   0xb   : > { %p350_p3 = scmp.lt.s32.totalorder %s3349_s14, 1  ;;  %s3571_s19 = smov 16   ;;  %v4942_v10 = vmov 0.0   ;;  %v457_v11 = vlaneseq  ;;  %v3799_v15 = vld [vmem:[%s4940_s9 + $0x8] sm:$0xff]  ;;  %v3804_v16 = vld [vmem:[%s4940_s9] sm:$0xff]  ;;  %vm544_vm1 = vcmask 1043456  }
   0xc   : > { %s3572_s20 = smov 17   ;;  %615 = vmatprep.mubr.f32.mxu0 %v4942_v10  ;;  %704 = vmatprep.mubr.f32.mxu1 %v4942_v10  ;;  %s3574_s21 = smov 15   ;;  %v376_v59 = vld [vmem:[%s4932_s1 + $0x10] sm:$0xff]  ;;  %vm537_vm3 = vcmask 293888   ;;  %vm1762_vm10 = vcmask 1040384   ;;  %vm1746_vm11 = vcmask 72704  }
   0xd   : > { %s4974_s14 = smov (!%p350_p3, %s3349_s14), 1  ;;  %s3575_s22 = smov 1   ;;  %v3787_v12 = vshrl.u32 %v457_v11, 7  ;;  %v3793_v13 = vand.u32 127, %v457_v11  ;;  %vm3581_vm12 = vmmov 0   ;;  %vm3125_vm13 = vcmask 1041408  }
   0xe   : > { %s3513_s15 = smul.u32 80, %s4974_s14  ;;  %s3576_s23 = smov 127   ;;  %vm3109_vm14 = vcmask 15360  }
   0xf   : > { %s3577_s24 = smov 113   ;;  %v521_v14 = vsub.s32 1, %v3787_v12  ;;  %vm508_vm0 = vcmp.lt.s32.totalorder %v3793_v13, 16  ;;  %s3578_s29 = smov 112   ;;  %v472_v37 = vsub.s32 0, %v3787_v12  ;;  %vm459_vm2 = vcmp.lt.s32.totalorder %v3793_v13, 17 }
  0x10   : > { %s354_s18 = scalar_lea.vmem %s4931_s0, %s3513_s15  ;;  %s3579_s30 = smov 111   ;;  %v750_v56 = vsub.s32 2, %v3787_v12  ;;  %vm737_vm4 = vcmp.lt.s32.totalorder %v3793_v13, 15  ;;  %vm879_vm5 = vcmp.lt.s32.totalorder %v3793_v13, 1  ;;  %vm1114_vm6 = vcmp.lt.s32.totalorder %v3793_v13, 127 }
  0x11   : > { %v3653_v0 = vld [vmem:[%s354_s18 + $0x40] sm:$0xf]  ;;  %v3655_v1 = vld [vmem:[%s354_s18 + $0x30] sm:$0xff]  ;;  %v3661_v2 = vld [vmem:[%s354_s18 + $0x48] sm:$0xf]  ;;  %v3812_v19 = vrot.slane %v3799_v15, %v521_v14  ;;  %v3815_v20 = vrot.slane %v3804_v16, %v521_v14  ;;  %v3856_v44 = vrot.slane %v3799_v15, %v472_v37  ;;  %v3859_v45 = vrot.slane %v3804_v16, %v472_v37  ;;  %s359_s28 = scalar_lea.vmem %s4941_s10, %s3513_s15 }
  0x12   : > { %496 = vrot.lane.b32.xlu0 %v3653_v0, %s3571_s19  ;;  %494 = vrot.lane.b32.xlu1 %v3655_v1, %s3571_s19  ;;  %v3663_v3 = vld [vmem:[%s354_s18 + $0x38] sm:$0xff]  ;;  %v3669_v4 = vld [vmem:[%s354_s18 + $0x28] sm:$0xff]  ;;  %v3894_v11 = vrot.slane %v3804_v16, %v750_v56  ;;  %vm1256_vm7 = vcmp.lt.s32.totalorder %v3793_v13, 113  ;;  %vm1398_vm8 = vcmp.lt.s32.totalorder %v3793_v13, 112  ;;  %vm1540_vm9 = vcmp.lt.s32.totalorder %v3793_v13, 111 }
  0x13   : > { %v3671_v5 = vld [vmem:[%s354_s18 + $0x20] sm:$0xff]  ;;  %v3677_v6 = vld [vmem:[%s354_s18 + $0x18] sm:$0xff]  ;;  %v3679_v7 = vld [vmem:[%s354_s18 + $0x10] sm:$0xff] }
  0x14   : > { %v3689_v8 = vld [vmem:[%s354_s18 + $0x8] sm:$0xff]  ;;  %v3691_v9 = vld [vmem:[%s354_s18] sm:$0xff]  ;;  %v431_v13 = vld [vmem:[%s4934_s3 + $0x138] sm:$0xf] }
  0x16   : > { %506 = vrot.lane.b32.xlu0 %v3661_v2, %s3571_s19  ;;  %504 = vrot.lane.b32.xlu1 %v3663_v3, %s3571_s19 }
  0x1a   : > { %502 = vrot.lane.b32.xlu1 %v3669_v4, %s3571_s19  ;;  %492 = vrot.lane.b32.xlu0 %v3671_v5, %s3571_s19 }
  0x1e   : > { %500 = vrot.lane.b32.xlu1 %v3677_v6, %s3571_s19  ;;  %490 = vrot.lane.b32.xlu0 %v3679_v7, %s3571_s19 }
  0x22   : > { %455 = vrot.lane.b32.xlu1 %v3661_v2, %s3572_s20  ;;  %445 = vrot.lane.b32.xlu0 %v3653_v0, %s3572_s20 }
  0x26   : > { %498 = vrot.lane.b32.xlu1 %v3689_v8, %s3571_s19  ;;  %488 = vrot.lane.b32.xlu0 %v3691_v9, %s3571_s19 }
  0x2a   : > { %453 = vrot.lane.b32.xlu1 %v3663_v3, %s3572_s20  ;;  %443 = vrot.lane.b32.xlu0 %v3655_v1, %s3572_s20 }
  0x2e   : > { %735 = vrot.lane.b32.xlu1 %v3661_v2, %s3574_s21  ;;  %725 = vrot.lane.b32.xlu0 %v3653_v0, %s3574_s21 }
  0x32   : > { %451 = vrot.lane.b32.xlu1 %v3669_v4, %s3572_s20  ;;  %441 = vrot.lane.b32.xlu0 %v3671_v5, %s3572_s20 }
  0x36   : > { %733 = vrot.lane.b32.xlu1 %v3663_v3, %s3574_s21  ;;  %723 = vrot.lane.b32.xlu0 %v3655_v1, %s3574_s21 }
  0x3a   : > { %449 = vrot.lane.b32.xlu1 %v3677_v6, %s3572_s20  ;;  %439 = vrot.lane.b32.xlu0 %v3679_v7, %s3572_s20 }
  0x3e   : > { %731 = vrot.lane.b32.xlu1 %v3669_v4, %s3574_s21  ;;  %721 = vrot.lane.b32.xlu0 %v3671_v5, %s3574_s21 }
  0x42   : > { %447 = vrot.lane.b32.xlu1 %v3689_v8, %s3572_s20  ;;  %437 = vrot.lane.b32.xlu0 %v3691_v9, %s3572_s20 }
  0x46   : > { %729 = vrot.lane.b32.xlu1 %v3677_v6, %s3574_s21  ;;  %719 = vrot.lane.b32.xlu0 %v3679_v7, %s3574_s21 }
  0x4a   : > { %727 = vrot.lane.b32.xlu1 %v3689_v8, %s3574_s21  ;;  %717 = vrot.lane.b32.xlu0 %v3691_v9, %s3574_s21 }
  0x4e   : > { %877 = vrot.lane.b32.xlu1 %v3661_v2, %s3575_s22  ;;  %867 = vrot.lane.b32.xlu0 %v3653_v0, %s3575_s22 }
  0x52   : > { %875 = vrot.lane.b32.xlu1 %v3663_v3, %s3575_s22  ;;  %865 = vrot.lane.b32.xlu0 %v3655_v1, %s3575_s22 }
  0x56   : > { %873 = vrot.lane.b32.xlu1 %v3669_v4, %s3575_s22  ;;  %863 = vrot.lane.b32.xlu0 %v3671_v5, %s3575_s22 }
  0x5a   : > { %871 = vrot.lane.b32.xlu1 %v3677_v6, %s3575_s22  ;;  %861 = vrot.lane.b32.xlu0 %v3679_v7, %s3575_s22 }
  0x5e   : > { %869 = vrot.lane.b32.xlu1 %v3689_v8, %s3575_s22  ;;  %859 = vrot.lane.b32.xlu0 %v3691_v9, %s3575_s22 }
  0x62   : > { %1112 = vrot.lane.b32.xlu1 %v3661_v2, %s3576_s23  ;;  %1102 = vrot.lane.b32.xlu0 %v3653_v0, %s3576_s23 }
  0x66   : > { %1110 = vrot.lane.b32.xlu1 %v3663_v3, %s3576_s23  ;;  %1100 = vrot.lane.b32.xlu0 %v3655_v1, %s3576_s23 }
  0x6a   : > { %1254 = vrot.lane.b32.xlu1 %v3661_v2, %s3577_s24  ;;  %1244 = vrot.lane.b32.xlu0 %v3653_v0, %s3577_s24 }
  0x6e   : > { %1108 = vrot.lane.b32.xlu1 %v3669_v4, %s3576_s23  ;;  %1098 = vrot.lane.b32.xlu0 %v3671_v5, %s3576_s23 }
  0x72   : > { %1252 = vrot.lane.b32.xlu1 %v3663_v3, %s3577_s24  ;;  %1242 = vrot.lane.b32.xlu0 %v3655_v1, %s3577_s24 }
  0x76   : > { %1106 = vrot.lane.b32.xlu1 %v3677_v6, %s3576_s23  ;;  %1096 = vrot.lane.b32.xlu0 %v3679_v7, %s3576_s23 }
  0x7a   : > { %1250 = vrot.lane.b32.xlu1 %v3669_v4, %s3577_s24  ;;  %1240 = vrot.lane.b32.xlu0 %v3671_v5, %s3577_s24 }
  0x7e   : > { %1104 = vrot.lane.b32.xlu1 %v3689_v8, %s3576_s23  ;;  %1094 = vrot.lane.b32.xlu0 %v3691_v9, %s3576_s23 }
  0x82   : > { %1248 = vrot.lane.b32.xlu1 %v3677_v6, %s3577_s24  ;;  %1238 = vrot.lane.b32.xlu0 %v3679_v7, %s3577_s24 }
  0x84   : > { %v497_v17 = vpop.permute.xlu0 %496  ;;  %v495_v18 = vpop.permute.xlu1 %494 }
  0x86   : > { %1246 = vrot.lane.b32.xlu1 %v3689_v8, %s3577_s24  ;;  %1236 = vrot.lane.b32.xlu0 %v3691_v9, %s3577_s24 }
  0x88   : > { %v507_v21 = vpop.permute.xlu0 %506  ;;  %v505_v22 = vpop.permute.xlu1 %504 }
  0x89   : > { %v518_v23 = vsel %vm508_vm0, %v507_v21, %v497_v17  ;;  %v512_v24 = vsel %vm508_vm0, %v495_v18, %v505_v22  ;;  %v513_v25 = vsel %vm508_vm0, %v497_v17, %v507_v21  ;;  %v517_v26 = vsel %vm508_vm0, %v505_v22, %v495_v18  ;;  %v377_v21 = vld [vmem:[%s4932_s1 + $0x18] sm:$0x1] }
  0x8a   : > { %1396 = vrot.lane.b32.xlu1 %v3661_v2, %s3578_s29  ;;  %1386 = vrot.lane.b32.xlu0 %v3653_v0, %s3578_s29  ;;  %v536_v27 = vmul.f32 %v3812_v19, %v513_v25  ;;  %v535_v28 = vmul.f32 %v3815_v20, %v518_v23  ;;  %v534_v31 = vmul.f32 %v3812_v19, %v512_v24 }
  0x8b   : > { %v533_v34 = vmul.f32 %v3815_v20, %v517_v26  ;;  %v3901_v17 = vrot.slane %v3799_v15, %v750_v56 }
  0x8c   : > { %3356 = vmatprep.subr.msk.mxu0 %vm544_vm1, %v536_v27  ;;  %v503_v29 = vpop.permute.xlu1 %502  ;;  %v493_v30 = vpop.permute.xlu0 %492 }
  0x8d   : > { %v511_v32 = vsel %vm508_vm0, %v493_v30, %v503_v29  ;;  %v516_v33 = vsel %vm508_vm0, %v503_v29, %v493_v30  ;;  %3357 = vmatpush1.msk.msra.mxu0 %vm544_vm1, %v535_v28 }
  0x8e   : > { %575 = vmatprep.subr.mxu0 %v534_v31  ;;  %1394 = vrot.lane.b32.xlu1 %v3663_v3, %s3578_s29  ;;  %v532_v35 = vmul.f32 %v3812_v19, %v511_v32  ;;  %v531_v36 = vmul.f32 %v3815_v20, %v516_v33 }
  0x8f   : > { %1384 = vrot.lane.b32.xlu0 %v3655_v1, %s3578_s29  ;;  %576 = vmatpush1.msra.mxu0 %v533_v34 }
  0x90   : > { %577 = vmatprep.subr.mxu0 %v532_v35  ;;  %v501_v38 = vpop.permute.xlu1 %500  ;;  %v491_v39 = vpop.permute.xlu0 %490 }
  0x91   : > { %v510_v40 = vsel %vm508_vm0, %v491_v39, %v501_v38  ;;  %v515_v41 = vsel %vm508_vm0, %v501_v38, %v491_v39  ;;  %578 = vmatpush1.msra.mxu0 %v531_v36 }
  0x92   : > { %1538 = vrot.lane.b32.xlu1 %v3661_v2, %s3579_s30  ;;  %v530_v42 = vmul.f32 %v3812_v19, %v510_v40  ;;  %v529_v43 = vmul.f32 %v3815_v20, %v515_v41 }
  0x93   : > { %1528 = vrot.lane.b32.xlu0 %v3653_v0, %s3579_s30 }
  0x94   : > { %v456_v46 = vpop.permute.xlu1 %455  ;;  %579 = vmatprep.subr.mxu0 %v530_v42  ;;  %v446_v47 = vpop.permute.xlu0 %445  ;;  %v3580_v42 = vmov 0  }
  0x95   : > { %v469_v48 = vsel %vm459_vm2, %v456_v46, %v446_v47  ;;  %580 = vmatpush1.msra.mxu0 %v529_v43  ;;  %v464_v49 = vsel %vm459_vm2, %v446_v47, %v456_v46  ;;  %3534 = vset.pattern.permute.xlu1 %v3580_v42 }
  0x96   : > { %1392 = vrot.lane.b32.xlu1 %v3669_v4, %s3578_s29  ;;  %v487_v50 = vmul.f32 %v3856_v44, %v464_v49  ;;  %v486_v51 = vmul.f32 %v3859_v45, %v469_v48  ;;  %3533 = vset.pattern.permute.xlu0 %v3580_v42  ;;  %v1662_v49 = vld [vmem:[%s4933_s2] sm:$0xff]  ;;  %v379_v42 = vld [vmem:[%s4932_s1 + $0x28] sm:$0x1] }
  0x97   : > { %1382 = vrot.lane.b32.xlu0 %v3671_v5, %s3578_s29 }
  0x98   : > { %3360 = vmatprep.subr.msk.mxu1 %vm544_vm1, %v487_v50  ;;  %v499_v52 = vpop.permute.xlu1 %498  ;;  %v489_v53 = vpop.permute.xlu0 %488 }
  0x99   : > { %v509_v54 = vsel %vm508_vm0, %v489_v53, %v499_v52  ;;  %v514_v55 = vsel %vm508_vm0, %v499_v52, %v489_v53  ;;  %3361 = vmatpush1.msk.msra.mxu1 %vm544_vm1, %v486_v51  ;;  %v1663_v52 = vld [vmem:[%s4933_s2 + $0x8] sm:$0x1] }
  0x9a   : > { %1536 = vrot.lane.b32.xlu1 %v3663_v3, %s3579_s30  ;;  %v528_v57 = vmul.f32 %v3812_v19, %v509_v54  ;;  %v527_v58 = vmul.f32 %v3815_v20, %v514_v55 }
  0x9b   : > { %1526 = vrot.lane.b32.xlu0 %v3655_v1, %s3579_s30 }
  0x9c   : > { %v454_v60 = vpop.permute.xlu1 %453  ;;  %581 = vmatprep.subr.mxu0 %v528_v57  ;;  %v444_v61 = vpop.permute.xlu0 %443 }
  0x9d   : > { %v463_v62 = vsel %vm459_vm2, %v444_v61, %v454_v60  ;;  %v468_v63 = vsel %vm459_vm2, %v454_v60, %v444_v61  ;;  %582 = vmatpush1.msra.mxu0 %v527_v58 }
  0x9e   : > { %1390 = vrot.lane.b32.xlu1 %v3677_v6, %s3578_s29  ;;  %v485_v14 = vmul.f32 %v3856_v44, %v463_v62  ;;  %v484_v18 = vmul.f32 %v3859_v45, %v468_v63  ;;  %3358 = vmatmul.mubr.msk.f32.vlgmr.msra.gmra.mxu0 %vm537_vm3, %v376_v59  ;;  %v374_v63 = vld [vmem:[%s4932_s1] sm:$0xff] }
  0x9f   : > { %1380 = vrot.lane.b32.xlu0 %v3679_v7, %s3578_s29  ;;  %621 = vmatprep.mubr.f32.mxu0 %v4942_v10 }
  0xa0   : > { %v736_v22 = vpop.permute.xlu1 %735  ;;  %664 = vmatprep.subr.mxu1 %v485_v14  ;;  %v726_v23 = vpop.permute.xlu0 %725 }
  0xa1   : > { %v742_v24 = vsel %vm737_vm4, %v726_v23, %v736_v22  ;;  %v747_v25 = vsel %vm737_vm4, %v736_v22, %v726_v23  ;;  %665 = vmatpush1.msra.mxu1 %v484_v18 }
  0xa2   : > { %v764_v26 = vmul.f32 %v3894_v11, %v747_v25  ;;  %v765_v27 = vmul.f32 %v3901_v17, %v742_v24  ;;  %1534 = vrot.lane.b32.xlu1 %v3669_v4, %s3579_s30  ;;  %3359 = vmatmul.mubr.msk.f32.gmra.mxu0 %vm537_vm3, %v377_v21  ;;  %v892_v25 = vsub.s32 3, %v3787_v12 }
  0xa3   : > { %1524 = vrot.lane.b32.xlu0 %v3671_v5, %s3579_s30  ;;  %842 = vmatprep.mubr.f32.mxu0 %v4942_v10 }
  0xa4   : > { %v452_v28 = vpop.permute.xlu1 %451  ;;  %3364 = vmatprep.subr.msk.mxu0 %vm544_vm1, %v765_v27  ;;  %v442_v29 = vpop.permute.xlu0 %441 }
  0xa5   : > { %v462_v30 = vsel %vm459_vm2, %v442_v29, %v452_v28  ;;  %v467_v31 = vsel %vm459_vm2, %v452_v28, %v442_v29  ;;  %3365 = vmatpush1.msk.msra.mxu0 %vm544_vm1, %v764_v26  ;;  %v375_v26 = vld [vmem:[%s4932_s1 + $0x8] sm:$0x1] }
  0xa6   : > { %1388 = vrot.lane.b32.xlu1 %v3689_v8, %s3578_s29  ;;  %v483_v32 = vmul.f32 %v3856_v44, %v462_v30  ;;  %v482_v33 = vmul.f32 %v3859_v45, %v467_v31 }
  0xa7   : > { %1378 = vrot.lane.b32.xlu0 %v3691_v9, %s3578_s29 }
  0xa8   : > { %v734_v34 = vpop.permute.xlu1 %733  ;;  %666 = vmatprep.subr.mxu1 %v483_v32  ;;  %v724_v35 = vpop.permute.xlu0 %723 }
  0xa9   : > { %v741_v36 = vsel %vm737_vm4, %v724_v35, %v734_v34  ;;  %v746_v37 = vsel %vm737_vm4, %v734_v34, %v724_v35  ;;  %667 = vmatpush1.msra.mxu1 %v482_v33  ;;  %v3996_v33 = vrot.slane %v3804_v16, %v892_v25  ;;  %v3999_v34 = vrot.slane %v3799_v15, %v892_v25  ;;  %v378_v35 = vld [vmem:[%s4932_s1 + $0x20] sm:$0xff] }
  0xaa   : > { %v762_v38 = vmul.f32 %v3894_v11, %v746_v37  ;;  %1532 = vrot.lane.b32.xlu1 %v3677_v6, %s3579_s30  ;;  %v763_v39 = vmul.f32 %v3901_v17, %v741_v36 }
  0xab   : > { %1522 = vrot.lane.b32.xlu0 %v3679_v7, %s3579_s30 }
  0xac   : > { %v450_v40 = vpop.permute.xlu1 %449  ;;  %802 = vmatprep.subr.mxu0 %v763_v39  ;;  %v440_v41 = vpop.permute.xlu0 %439 }
  0xad   : > { %v461_v43 = vsel %vm459_vm2, %v440_v41, %v450_v40  ;;  %v466_v46 = vsel %vm459_vm2, %v450_v40, %v440_v41  ;;  %803 = vmatpush1.msra.mxu0 %v762_v38 }
  0xae   : > { %1530 = vrot.lane.b32.xlu1 %v3689_v8, %s3579_s30  ;;  %v481_v47 = vmul.f32 %v3856_v44, %v461_v43  ;;  %v480_v48 = vmul.f32 %v3859_v45, %v466_v46 }
  0xaf   : > { %1520 = vrot.lane.b32.xlu0 %v3691_v9, %s3579_s30 }
  0xb0   : > { %v732_v50 = vpop.permute.xlu1 %731  ;;  %668 = vmatprep.subr.mxu1 %v481_v47  ;;  %v722_v51 = vpop.permute.xlu0 %721 }
  0xb1   : > { %v740_v53 = vsel %vm737_vm4, %v722_v51, %v732_v50  ;;  %v745_v54 = vsel %vm737_vm4, %v732_v50, %v722_v51  ;;  %669 = vmatpush1.msra.mxu1 %v480_v48 }
  0xb2   : > { %v760_v55 = vmul.f32 %v3894_v11, %v745_v54  ;;  %v761_v56 = vmul.f32 %v3901_v17, %v740_v53  ;;  %1666 = vperm.xlu1 %3534, %v1662_v49  }
  0xb3   : > { %1671 = vperm.xlu0 %3533, %v1663_v52  }
  0xb4   : > { %v448_v57 = vpop.permute.xlu1 %447  ;;  %804 = vmatprep.subr.mxu0 %v761_v56  ;;  %v438_v58 = vpop.permute.xlu0 %437 }
  0xb5   : > { %v460_v59 = vsel %vm459_vm2, %v438_v58, %v448_v57  ;;  %v465_v60 = vsel %vm459_vm2, %v448_v57, %v438_v58  ;;  %805 = vmatpush1.msra.mxu0 %v760_v55  ;;  %v1127_v55 = vsub.s32 5, %v3787_v12 }
  0xb6   : > { %v479_v61 = vmul.f32 %v3856_v44, %v460_v59  ;;  %v478_v62 = vmul.f32 %v3859_v45, %v465_v60 }
  0xb8   : > { %v730_v14 = vpop.permute.xlu1 %729  ;;  %670 = vmatprep.subr.mxu1 %v479_v61  ;;  %v720_v18 = vpop.permute.xlu0 %719 }
  0xb9   : > { %v739_v21 = vsel %vm737_vm4, %v720_v18, %v730_v14  ;;  %v744_v22 = vsel %vm737_vm4, %v730_v14, %v720_v18  ;;  %671 = vmatpush1.msra.mxu1 %v478_v62  ;;  %v4070_v62 = vrot.slane %v3804_v16, %v1127_v55  ;;  %v380_v14 = vld [vmem:[%s4932_s1 + $0x30] sm:$0xff] }
  0xba   : > { %v758_v23 = vmul.f32 %v3894_v11, %v744_v22  ;;  %v759_v24 = vmul.f32 %v3901_v17, %v739_v21  ;;  %3362 = vmatmul.mubr.msk.f32.vlgmr.msra.gmra.mxu1 %vm537_vm3, %v374_v63  ;;  %v4073_v63 = vrot.slane %v3799_v15, %v1127_v55 }
  0xbb   : > { %710 = vmatprep.mubr.f32.mxu1 %v4942_v10 }
  0xbc   : > { %v728_v27 = vpop.permute.xlu1 %727  ;;  %806 = vmatprep.subr.mxu0 %v759_v24  ;;  %v718_v28 = vpop.permute.xlu0 %717 }
  0xbd   : > { %v738_v29 = vsel %vm737_vm4, %v718_v28, %v728_v27  ;;  %v743_v30 = vsel %vm737_vm4, %v728_v27, %v718_v28  ;;  %807 = vmatpush1.msra.mxu0 %v758_v23  ;;  %v381_v27 = vld [vmem:[%s4932_s1 + $0x38] sm:$0x1] }
  0xbe   : > { %v756_v31 = vmul.f32 %v3894_v11, %v743_v30  ;;  %v757_v32 = vmul.f32 %v3901_v17, %v738_v29  ;;  %3363 = vmatmul.mubr.msk.f32.gmra.mxu1 %vm537_vm3, %v375_v26  ;;  %v1269_v26 = vsub.s32 6, %v3787_v12 }
  0xbf   : > { %984 = vmatprep.mubr.f32.mxu1 %v4942_v10 }
  0xc0   : > { %v878_v36 = vpop.permute.xlu1 %877  ;;  %808 = vmatprep.subr.mxu0 %v757_v32  ;;  %v868_v37 = vpop.permute.xlu0 %867 }
  0xc1   : > { %v884_v38 = vsel %vm879_vm5, %v868_v37, %v878_v36  ;;  %v889_v39 = vsel %vm879_vm5, %v878_v36, %v868_v37  ;;  %809 = vmatpush1.msra.mxu0 %v756_v31  ;;  %v4100_v36 = vrot.slane %v3804_v16, %v1269_v26  ;;  %v4103_v37 = vrot.slane %v3799_v15, %v1269_v26 }
  0xc2   : > { %v906_v40 = vmul.f32 %v3996_v33, %v889_v39  ;;  %v907_v41 = vmul.f32 %v3999_v34, %v884_v38  ;;  %3372 = vmatprep.subr.msk.mxu0 %vm544_vm1, %v3661_v2  ;;  %3366 = vmatmul.mubr.msk.f32.vlgmr.msra.gmra.mxu0 %vm537_vm3, %v378_v35 }
  0xc3   : > { %3373 = vmatpush1.msk.msra.mxu0 %vm544_vm1, %v3653_v0  ;;  %848 = vmatprep.mubr.f32.mxu0 %v4942_v10 }
  0xc4   : > { %v876_v43 = vpop.permute.xlu1 %875  ;;  %3368 = vmatprep.subr.msk.mxu1 %vm544_vm1, %v907_v41  ;;  %v866_v46 = vpop.permute.xlu0 %865  ;;  %1037 = vmatprep.subr.mxu0 %v3663_v3 }
  0xc5   : > { %v883_v2 = vsel %vm879_vm5, %v866_v46, %v876_v43  ;;  %v888_v47 = vsel %vm879_vm5, %v876_v43, %v866_v46  ;;  %3369 = vmatpush1.msk.msra.mxu1 %vm544_vm1, %v906_v40  ;;  %1038 = vmatpush1.msra.mxu0 %v3655_v1 }
  0xc6   : > { %v904_v0 = vmul.f32 %v3996_v33, %v888_v47  ;;  %v905_v48 = vmul.f32 %v3999_v34, %v883_v2  ;;  %1039 = vmatprep.subr.mxu0 %v3669_v4  ;;  %3367 = vmatmul.mubr.msk.f32.gmra.mxu0 %vm537_vm3, %v379_v42  ;;  %v382_v4 = vld [vmem:[%s4932_s1 + $0x40] sm:$0xff] }
  0xc7   : > { %1040 = vmatpush1.msra.mxu0 %v3671_v5  ;;  %1077 = vmatprep.mubr.f32.mxu0 %v4942_v10 }
  0xc8   : > { %v874_v3 = vpop.permute.xlu1 %873  ;;  %944 = vmatprep.subr.mxu1 %v905_v48  ;;  %v864_v49 = vpop.permute.xlu0 %863  ;;  %1041 = vmatprep.subr.mxu0 %v3677_v6 }
  0xc9   : > { %v882_v1 = vsel %vm879_vm5, %v864_v49, %v874_v3  ;;  %v887_v50 = vsel %vm879_vm5, %v874_v3, %v864_v49  ;;  %945 = vmatpush1.msra.mxu1 %v904_v0  ;;  %1042 = vmatpush1.msra.mxu0 %v3679_v7 }
  0xca   : > { %v902_v5 = vmul.f32 %v3996_v33, %v887_v50  ;;  %v903_v51 = vmul.f32 %v3999_v34, %v882_v1  ;;  %1043 = vmatprep.subr.mxu0 %v3689_v8  ;;  %v383_v8 = vld [vmem:[%s4932_s1 + $0x48] sm:$0x1] }
  0xcb   : > { %1044 = vmatpush1.msra.mxu0 %v3691_v9 }
  0xcc   : > { %v872_v6 = vpop.permute.xlu1 %871  ;;  %946 = vmatprep.subr.mxu1 %v903_v51  ;;  %v862_v52 = vpop.permute.xlu0 %861  ;;  %3374 = vmatmul.mubr.msk.f32.vlgmr.msra.gmra.mxu0 %vm537_vm3, %v382_v4 }
  0xcd   : > { %v881_v7 = vsel %vm879_vm5, %v862_v52, %v872_v6  ;;  %v886_v53 = vsel %vm879_vm5, %v872_v6, %v862_v52  ;;  %947 = vmatpush1.msra.mxu1 %v902_v5  ;;  %1083 = vmatprep.mubr.f32.mxu0 %v4942_v10 }
  0xce   : > { %v900_v9 = vmul.f32 %v3996_v33, %v886_v53  ;;  %v901_v54 = vmul.f32 %v3999_v34, %v881_v7 }
  0xd0   : > { %v870_v56 = vpop.permute.xlu1 %869  ;;  %948 = vmatprep.subr.mxu1 %v901_v54  ;;  %v860_v57 = vpop.permute.xlu0 %859  ;;  %3375 = vmatmul.mubr.msk.f32.gmra.mxu0 %vm537_vm3, %v383_v8 }
  0xd1   : > { %v880_v58 = vsel %vm879_vm5, %v860_v57, %v870_v56  ;;  %v885_v59 = vsel %vm879_vm5, %v870_v56, %v860_v57  ;;  %949 = vmatpush1.msra.mxu1 %v900_v9  ;;  %1361 = vmatprep.mubr.f32.mxu0 %v4942_v10 }
  0xd2   : > { %v898_v60 = vmul.f32 %v3996_v33, %v885_v59  ;;  %v899_v61 = vmul.f32 %v3999_v34, %v880_v58 }
  0xd4   : > { %v1113_v18 = vpop.permute.xlu1 %1112  ;;  %950 = vmatprep.subr.mxu1 %v899_v61  ;;  %v1103_v21 = vpop.permute.xlu0 %1102 }
  0xd5   : > { %v1119_v22 = vsel %vm1114_vm6, %v1103_v21, %v1113_v18  ;;  %v1124_v23 = vsel %vm1114_vm6, %v1113_v18, %v1103_v21  ;;  %951 = vmatpush1.msra.mxu1 %v898_v60 }
  0xd6   : > { %v1141_v24 = vmul.f32 %v4070_v62, %v1119_v22  ;;  %v1142_v25 = vmul.f32 %v4073_v63, %v1124_v23  ;;  %3370 = vmatmul.mubr.msk.f32.vlgmr.msra.gmra.mxu1 %vm537_vm3, %v380_v14  ;;  %v384_v23 = vld [vmem:[%s4932_s1 + $0x50] sm:$0xff] }
  0xd7   : > { %990 = vmatprep.mubr.f32.mxu1 %v4942_v10 }
  0xd8   : > { %v1111_v28 = vpop.permute.xlu1 %1110  ;;  %3376 = vmatprep.subr.msk.mxu1 %vm544_vm1, %v1142_v25  ;;  %v1101_v29 = vpop.permute.xlu0 %1100 }
  0xd9   : > { %v1118_v30 = vsel %vm1114_vm6, %v1101_v29, %v1111_v28  ;;  %v1123_v31 = vsel %vm1114_vm6, %v1111_v28, %v1101_v29  ;;  %3377 = vmatpush1.msk.msra.mxu1 %vm544_vm1, %v1141_v24 }
  0xda   : > { %v1139_v32 = vmul.f32 %v4070_v62, %v1118_v30  ;;  %v1140_v35 = vmul.f32 %v4073_v63, %v1123_v31  ;;  %3371 = vmatmul.mubr.msk.f32.gmra.mxu1 %vm537_vm3, %v381_v27  ;;  %v1411_v30 = vsub.s32 7, %v3787_v12  ;;  %v385_v31 = vld [vmem:[%s4932_s1 + $0x58] sm:$0x1] }
  0xdb   : > { %1219 = vmatprep.mubr.f32.mxu1 %v4942_v10 }
  0xdc   : > { %v1255_v38 = vpop.permute.xlu1 %1254  ;;  %1179 = vmatprep.subr.mxu1 %v1140_v35  ;;  %v1245_v39 = vpop.permute.xlu0 %1244 }
  0xdd   : > { %v1261_v40 = vsel %vm1256_vm7, %v1245_v39, %v1255_v38  ;;  %v1266_v41 = vsel %vm1256_vm7, %v1255_v38, %v1245_v39  ;;  %1180 = vmatpush1.msra.mxu1 %v1139_v32 }
  0xde   : > { %v1283_v42 = vmul.f32 %v4100_v36, %v1261_v40  ;;  %v1284_v43 = vmul.f32 %v4103_v37, %v1266_v41  ;;  %v4168_v41 = vrot.slane %v3804_v16, %v1411_v30 }
  0xe0   : > { %v1109_v46 = vpop.permute.xlu1 %1108  ;;  %3380 = vmatprep.subr.msk.mxu0 %vm544_vm1, %v1284_v43  ;;  %v1099_v2 = vpop.permute.xlu0 %1098  ;;  %v386_v43 = vld [vmem:[%s4932_s1 + $0x60] sm:$0xff] }
  0xe1   : > { %v1117_v47 = vsel %vm1114_vm6, %v1099_v2, %v1109_v46  ;;  %v1122_v0 = vsel %vm1114_vm6, %v1109_v46, %v1099_v2  ;;  %3381 = vmatpush1.msk.msra.mxu0 %vm544_vm1, %v1283_v42  ;;  %v4171_v42 = vrot.slane %v3799_v15, %v1411_v30 }
  0xe2   : > { %v1137_v48 = vmul.f32 %v4070_v62, %v1117_v47  ;;  %v1138_v3 = vmul.f32 %v4073_v63, %v1122_v0 }
  0xe4   : > { %v1253_v49 = vpop.permute.xlu1 %1252  ;;  %1181 = vmatprep.subr.mxu1 %v1138_v3  ;;  %v1243_v1 = vpop.permute.xlu0 %1242 }
  0xe5   : > { %v1260_v50 = vsel %vm1256_vm7, %v1243_v1, %v1253_v49  ;;  %v1265_v4 = vsel %vm1256_vm7, %v1253_v49, %v1243_v1  ;;  %1182 = vmatpush1.msra.mxu1 %v1137_v48  ;;  %v387_v48 = vld [vmem:[%s4932_s1 + $0x68] sm:$0x1] }
  0xe6   : > { %v1281_v5 = vmul.f32 %v4100_v36, %v1260_v50  ;;  %v1282_v51 = vmul.f32 %v4103_v37, %v1265_v4 }
  0xe8   : > { %v1107_v6 = vpop.permute.xlu1 %1106  ;;  %1321 = vmatprep.subr.mxu0 %v1282_v51  ;;  %v1097_v52 = vpop.permute.xlu0 %1096 }
  0xe9   : > { %v1116_v7 = vsel %vm1114_vm6, %v1097_v52, %v1107_v6  ;;  %v1121_v53 = vsel %vm1114_vm6, %v1107_v6, %v1097_v52  ;;  %1322 = vmatpush1.msra.mxu0 %v1281_v5  ;;  %v4203_v6 = vld [vmem:[%s4940_s9 + $0x10] ss:$0 sm:$0xff]  ;;  %v4208_v52 = vld [vmem:[%s4940_s9 + $0x18] ss:$0 sm:$0xff] }
  0xea   : > { %v1135_v8 = vmul.f32 %v4070_v62, %v1116_v7  ;;  %v1136_v9 = vmul.f32 %v4073_v63, %v1121_v53 }
  0xec   : > { %v1251_v54 = vpop.permute.xlu1 %1250  ;;  %1183 = vmatprep.subr.mxu1 %v1136_v9  ;;  %v1241_v55 = vpop.permute.xlu0 %1240 }
  0xed   : > { %v1259_v56 = vsel %vm1256_vm7, %v1241_v55, %v1251_v54  ;;  %v1264_v57 = vsel %vm1256_vm7, %v1251_v54, %v1241_v55  ;;  %1184 = vmatpush1.msra.mxu1 %v1135_v8 }
  0xee   : > { %v1279_v58 = vmul.f32 %v4100_v36, %v1259_v56  ;;  %v1280_v59 = vmul.f32 %v4103_v37, %v1264_v57 }
  0xf0   : > { %v1105_v60 = vpop.permute.xlu1 %1104  ;;  %1323 = vmatprep.subr.mxu0 %v1280_v59  ;;  %v1095_v61 = vpop.permute.xlu0 %1094 }
  0xf1   : > { %v1115_v14 = vsel %vm1114_vm6, %v1095_v61, %v1105_v60  ;;  %v1120_v18 = vsel %vm1114_vm6, %v1105_v60, %v1095_v61  ;;  %1324 = vmatpush1.msra.mxu0 %v1279_v58 }
  0xf2   : > { %v1133_v21 = vmul.f32 %v4070_v62, %v1115_v14  ;;  %v1134_v22 = vmul.f32 %v4073_v63, %v1120_v18 }
  0xf4   : > { %v1249_v24 = vpop.permute.xlu1 %1248  ;;  %1185 = vmatprep.subr.mxu1 %v1134_v22  ;;  %v1239_v25 = vpop.permute.xlu0 %1238 }
  0xf5   : > { %v1258_v26 = vsel %vm1256_vm7, %v1239_v25, %v1249_v24  ;;  %v1263_v27 = vsel %vm1256_vm7, %v1249_v24, %v1239_v25  ;;  %1186 = vmatpush1.msra.mxu1 %v1133_v21 }
  0xf6   : > { %v1277_v28 = vmul.f32 %v4100_v36, %v1258_v26  ;;  %v1278_v29 = vmul.f32 %v4103_v37, %v1263_v27  ;;  %3378 = vmatmul.mubr.msk.f32.vlgmr.msra.gmra.mxu1 %vm537_vm3, %v384_v23 }
  0xf7   : > { %1225 = vmatprep.mubr.f32.mxu1 %v4942_v10 }
  0xf8   : > { %v1247_v32 = vpop.permute.xlu1 %1246  ;;  %1325 = vmatprep.subr.mxu0 %v1278_v29  ;;  %v1237_v35 = vpop.permute.xlu0 %1236 }
  0xf9   : > { %v1257_v38 = vsel %vm1256_vm7, %v1237_v35, %v1247_v32  ;;  %v1262_v39 = vsel %vm1256_vm7, %v1247_v32, %v1237_v35  ;;  %1326 = vmatpush1.msra.mxu0 %v1277_v28 }
  0xfa   : > { %v1275_v12 = vmul.f32 %v4100_v36, %v1257_v38  ;;  %v1276_v40 = vmul.f32 %v4103_v37, %v1262_v39  ;;  %3379 = vmatmul.mubr.msk.f32.gmra.mxu1 %vm537_vm3, %v385_v31 }
  0xfb   : > { %1503 = vmatprep.mubr.f32.mxu1 %v4942_v10 }
  0xfc   : > { %v1397_v46 = vpop.permute.xlu1 %1396  ;;  %1327 = vmatprep.subr.mxu0 %v1276_v40  ;;  %v1387_v2 = vpop.permute.xlu0 %1386 }
  0xfd   : > { %v1403_v47 = vsel %vm1398_vm8, %v1387_v2, %v1397_v46  ;;  %v1408_v16 = vsel %vm1398_vm8, %v1397_v46, %v1387_v2  ;;  %1328 = vmatpush1.msra.mxu0 %v1275_v12 }
  0xfe   : > { %v1425_v15 = vmul.f32 %v4168_v41, %v1403_v47  ;;  %v1426_v0 = vmul.f32 %v4171_v42, %v1408_v16  ;;  %3382 = vmatmul.mubr.msk.f32.vlgmr.msra.gmra.mxu0 %vm537_vm3, %v386_v43 }
  0xff   : > { %1367 = vmatprep.mubr.f32.mxu0 %v4942_v10 }
 0x100   : > { %v1395_v3 = vpop.permute.xlu1 %1394  ;;  %3384 = vmatprep.subr.msk.mxu1 %vm544_vm1, %v1426_v0 }
 0x101   : > { %v1385_v49 = vpop.permute.xlu0 %1384  ;;  %3385 = vmatpush1.msk.msra.mxu1 %vm544_vm1, %v1425_v15  ;;  %v388_v15 = vld [vmem:[%s4932_s1 + $0x70] sm:$0xff] }
 0x102   : > { %v1402_v1 = vsel %vm1398_vm8, %v1385_v49, %v1395_v3  ;;  %v1407_v50 = vsel %vm1398_vm8, %v1395_v3, %v1385_v49  ;;  %3383 = vmatmul.mubr.msk.f32.gmra.mxu0 %vm537_vm3, %v387_v48 }
 0x103   : > { %v1423_v4 = vmul.f32 %v4168_v41, %v1402_v1  ;;  %v1424_v5 = vmul.f32 %v4171_v42, %v1407_v50  ;;  %1645 = vmatprep.mubr.f32.mxu0 %v4942_v10 }
 0x104   : > { %v1539_v51 = vpop.permute.xlu1 %1538 }
 0x105   : > { %1463 = vmatprep.subr.mxu1 %v1424_v5  ;;  %v1529_v7 = vpop.permute.xlu0 %1528 }
 0x106   : > { %v1545_v53 = vsel %vm1540_vm9, %v1529_v7, %v1539_v51  ;;  %v1550_v8 = vsel %vm1540_vm9, %v1539_v51, %v1529_v7  ;;  %1464 = vmatpush1.msra.mxu1 %v1423_v4  ;;  %v389_v4 = vld [vmem:[%s4932_s1 + $0x78] sm:$0x1] }
 0x107   : > { %v1567_v9 = vmul.f32 %v4203_v6, %v1545_v53  ;;  %v1568_v54 = vmul.f32 %v4208_v52, %v1550_v8 }
 0x108   : > { %v1393_v55 = vpop.permute.xlu1 %1392 }
 0x109   : > { %3390 = vmatprep.subr.msk.mxu0 %vm544_vm1, %v1568_v54  ;;  %v1383_v56 = vpop.permute.xlu0 %1382  ;;  %v391_v54 = vld [vmem:[%s4932_s1 + $0x88] sm:$0x1] }
 0x10a   : > { %v1401_v57 = vsel %vm1398_vm8, %v1383_v56, %v1393_v55  ;;  %v1406_v58 = vsel %vm1398_vm8, %v1393_v55, %v1383_v56  ;;  %3391 = vmatpush1.msk.msra.mxu0 %vm544_vm1, %v1567_v9  ;;  %v390_v9 = vld [vmem:[%s4932_s1 + $0x80] sm:$0xff] }
 0x10b   : > { %v1421_v59 = vmul.f32 %v4168_v41, %v1401_v57  ;;  %v1422_v60 = vmul.f32 %v4171_v42, %v1406_v58 }
 0x10c   : > { %v1537_v61 = vpop.permute.xlu1 %1536 }
 0x10d   : > { %1465 = vmatprep.subr.mxu1 %v1422_v60  ;;  %v1527_v14 = vpop.permute.xlu0 %1526 }
 0x10e   : > { %v1544_v18 = vsel %vm1540_vm9, %v1527_v14, %v1537_v61  ;;  %v1549_v21 = vsel %vm1540_vm9, %v1537_v61, %v1527_v14  ;;  %1466 = vmatpush1.msra.mxu1 %v1421_v59 }
 0x10f   : > { %v1565_v22 = vmul.f32 %v4203_v6, %v1544_v18  ;;  %v1566_v23 = vmul.f32 %v4208_v52, %v1549_v21 }
 0x110   : > { %v1391_v24 = vpop.permute.xlu1 %1390 }
 0x111   : > { %1605 = vmatprep.subr.mxu0 %v1566_v23  ;;  %v1381_v25 = vpop.permute.xlu0 %1380 }
 0x112   : > { %v1400_v26 = vsel %vm1398_vm8, %v1381_v25, %v1391_v24  ;;  %v1405_v27 = vsel %vm1398_vm8, %v1391_v24, %v1381_v25  ;;  %1606 = vmatpush1.msra.mxu0 %v1565_v22 }
 0x113   : > { %v1419_v28 = vmul.f32 %v4168_v41, %v1400_v26  ;;  %v1420_v29 = vmul.f32 %v4171_v42, %v1405_v27 }
 0x114   : > { %v1535_v30 = vpop.permute.xlu1 %1534 }
 0x115   : > { %1467 = vmatprep.subr.mxu1 %v1420_v29  ;;  %v1525_v31 = vpop.permute.xlu0 %1524 }
 0x116   : > { %v1543_v32 = vsel %vm1540_vm9, %v1525_v31, %v1535_v30  ;;  %v1548_v35 = vsel %vm1540_vm9, %v1535_v30, %v1525_v31  ;;  %1468 = vmatpush1.msra.mxu1 %v1419_v28 }
 0x117   : > { %v1563_v38 = vmul.f32 %v4203_v6, %v1543_v32  ;;  %v1564_v39 = vmul.f32 %v4208_v52, %v1548_v35 }
 0x118   : > { %v1389_v12 = vpop.permute.xlu1 %1388 }
 0x119   : > { %1607 = vmatprep.subr.mxu0 %v1564_v39  ;;  %v1379_v40 = vpop.permute.xlu0 %1378 }
 0x11a   : > { %v1399_v43 = vsel %vm1398_vm8, %v1379_v40, %v1389_v12  ;;  %v1404_v46 = vsel %vm1398_vm8, %v1389_v12, %v1379_v40  ;;  %1608 = vmatpush1.msra.mxu0 %v1563_v38 }
 0x11b   : > { %v1417_v2 = vmul.f32 %v4168_v41, %v1399_v43  ;;  %v1418_v47 = vmul.f32 %v4171_v42, %v1404_v46 }
 0x11c   : > { %v1533_v16 = vpop.permute.xlu1 %1532 }
 0x11d   : > { %1469 = vmatprep.subr.mxu1 %v1418_v47  ;;  %v1523_v0 = vpop.permute.xlu0 %1522 }
 0x11e   : > { %v1542_v48 = vsel %vm1540_vm9, %v1523_v0, %v1533_v16  ;;  %v1547_v3 = vsel %vm1540_vm9, %v1533_v16, %v1523_v0  ;;  %1470 = vmatpush1.msra.mxu1 %v1417_v2 }
 0x11f   : > { %v1561_v49 = vmul.f32 %v4203_v6, %v1542_v48  ;;  %v1562_v1 = vmul.f32 %v4208_v52, %v1547_v3  ;;  %3386 = vmatmul.mubr.msk.f32.vlgmr.msra.gmra.mxu1 %vm537_vm3, %v388_v15 }
 0x120   : > { %v1531_v50 = vpop.permute.xlu1 %1530  ;;  %1509 = vmatprep.mubr.f32.mxu1 %v4942_v10 }
 0x121   : > { %1609 = vmatprep.subr.mxu0 %v1562_v1  ;;  %v1521_v5 = vpop.permute.xlu0 %1520 }
 0x122   : > { %v1541_v51 = vsel %vm1540_vm9, %v1521_v5, %v1531_v50  ;;  %v1546_v7 = vsel %vm1540_vm9, %v1531_v50, %v1521_v5  ;;  %1610 = vmatpush1.msra.mxu0 %v1561_v49 }
 0x123   : > { %v1559_v53 = vmul.f32 %v4203_v6, %v1541_v51  ;;  %v1560_v8 = vmul.f32 %v4208_v52, %v1546_v7  ;;  %3387 = vmatmul.mubr.msk.f32.gmra.mxu1 %vm537_vm3, %v389_v4 }
 0x124   : > { %1833 = vmatprep.mubr.f32.mxu1 %v4942_v10 }
 0x125   : > { %1611 = vmatprep.subr.mxu0 %v1560_v8 }
 0x126   : > { %1612 = vmatpush1.msra.mxu0 %v1559_v53 }
 0x127   : > { %3392 = vmatmul.mubr.msk.f32.vlgmr.msra.gmra.mxu0 %vm537_vm3, %v390_v9 }
 0x128   : > { %1651 = vmatprep.mubr.f32.mxu0 %v4942_v10 }
 0x12b   : > { %3393 = vmatmul.mubr.msk.f32.gmra.mxu0 %vm537_vm3, %v391_v54 }
 0x12c   : > { %1949 = vmatprep.mubr.f32.mxu0 %v4942_v10 }
 0x15e   : > { %v617_v55 = vpop.f32.mrf.mxu0 }
 0x160   : > { %v619_v56 = vpop.f32.mrf.mxu0 }
 0x162   : > { %v623_v57 = vpop.f32.mrf.mxu0 }
 0x164   : > { %v625_v59 = vpop.f32.mrf.mxu0 }
 0x17a   : > { %v706_v58 = vpop.f32.mrf.mxu1 }
 0x17b   : > { %v707_v30 = vadd.f32 %v706_v58, %v617_v55 }
 0x17c   : > { %v708_v60 = vpop.f32.mrf.mxu1 }
 0x17d   : > { %v709_v31 = vadd.f32 %v708_v60, %v619_v56 }
 0x17e   : > { %v712_v14 = vpop.f32.mrf.mxu1 }
 0x17f   : > { %v713_v39 = vadd.f32 %v712_v14, %v623_v57 }
 0x180   : > { %v714_v21 = vpop.f32.mrf.mxu1 }
 0x181   : > { %v715_v40 = vadd.f32 %v714_v21, %v625_v59  ;;  %v1667_v21 = vpop.permute.xlu1 %1666 }
 0x182   : > { %v844_v61 = vpop.f32.mrf.mxu0 }
 0x183   : > { %v855_v38 = vadd.f32 %v844_v61, %v707_v30 }
 0x184   : > { %v846_v18 = vpop.f32.mrf.mxu0 }
 0x185   : > { %v856_v12 = vadd.f32 %v846_v18, %v709_v31 }
 0x186   : > { %v850_v22 = vpop.f32.mrf.mxu0 }
 0x187   : > { %v857_v2 = vadd.f32 %v850_v22, %v713_v39 }
 0x188   : > { %v852_v24 = vpop.f32.mrf.mxu0 }
 0x189   : > { %v858_v15 = vadd.f32 %v852_v24, %v715_v40 }
 0x18c   : > { %v1079_v26 = vpop.f32.mrf.mxu0 }
 0x18e   : > { %v1081_v28 = vpop.f32.mrf.mxu0 }
 0x190   : > { %v1085_v32 = vpop.f32.mrf.mxu0 }
 0x192   : > { %v1087_v43 = vpop.f32.mrf.mxu0 }
 0x196   : > { %v986_v23 = vpop.f32.mrf.mxu1 }
 0x197   : > { %v997_v47 = vadd.f32 %v986_v23, %v855_v38 }
 0x198   : > { %v988_v25 = vpop.f32.mrf.mxu1 }
 0x199   : > { %v998_v0 = vadd.f32 %v988_v25, %v856_v12  ;;  %v1090_v3 = vadd.f32 %v1079_v26, %v997_v47  ;;  %v1672_v12 = vpop.permute.xlu0 %1671 }
 0x19a   : > { %v992_v27 = vpop.f32.mrf.mxu1 }
 0x19b   : > { %v999_v49 = vadd.f32 %v992_v27, %v857_v2  ;;  %v1091_v50 = vadd.f32 %v1081_v28, %v998_v0 }
 0x19c   : > { %v994_v29 = vpop.f32.mrf.mxu1 }
 0x19d   : > { %v1000_v4 = vadd.f32 %v994_v29, %v858_v15  ;;  %v1092_v7 = vadd.f32 %v1085_v32, %v999_v49 }
 0x19f   : > { %v1093_v54 = vadd.f32 %v1087_v43, %v1000_v4 }
 0x1b6   : > { %v1221_v35 = vpop.f32.mrf.mxu1 }
 0x1b7   : > { %v1232_v53 = vadd.f32 %v1221_v35, %v1090_v3 }
 0x1b8   : > { %v1223_v46 = vpop.f32.mrf.mxu1 }
 0x1b9   : > { %v1233_v55 = vadd.f32 %v1223_v46, %v1091_v50 }
 0x1ba   : > { %v1227_v16 = vpop.f32.mrf.mxu1 }
 0x1bb   : > { %v1234_v57 = vadd.f32 %v1227_v16, %v1092_v7 }
 0x1bc   : > { %v1229_v1 = vpop.f32.mrf.mxu1 }
 0x1bd   : > { %v1235_v61 = vadd.f32 %v1229_v1, %v1093_v54 }
 0x1be   : > { %v1363_v48 = vpop.f32.mrf.mxu0 }
 0x1bf   : > { %v1374_v56 = vadd.f32 %v1363_v48, %v1232_v53 }
 0x1c0   : > { %v1365_v5 = vpop.f32.mrf.mxu0 }
 0x1c1   : > { %v1375_v60 = vadd.f32 %v1365_v5, %v1233_v55 }
 0x1c2   : > { %v1369_v8 = vpop.f32.mrf.mxu0 }
 0x1c3   : > { %v1376_v22 = vadd.f32 %v1369_v8, %v1234_v57 }
 0x1c4   : > { %v1371_v58 = vpop.f32.mrf.mxu0 }
 0x1c5   : > { %v1377_v27 = vadd.f32 %v1371_v58, %v1235_v61 }
 0x1df   : > { %v1505_v51 = vpop.f32.mrf.mxu1 }
 0x1e0   : > { %v1516_v14 = vadd.f32 %v1505_v51, %v1374_v56 }
 0x1e1   : > { %v1507_v9 = vpop.f32.mrf.mxu1 }
 0x1e2   : > { %v1517_v23 = vadd.f32 %v1507_v9, %v1375_v60 }
 0x1e3   : > { %v1511_v59 = vpop.f32.mrf.mxu1 }
 0x1e4   : > { %v1518_v28 = vadd.f32 %v1511_v59, %v1376_v22 }
 0x1e5   : > { %v1513_v25 = vpop.f32.mrf.mxu1 }
 0x1e6   : > { %v1519_v32 = vadd.f32 %v1513_v25, %v1377_v27 }
 0x1e7   : > { %v1647_v18 = vpop.f32.mrf.mxu0 }
 0x1e8   : > { %v1658_v24 = vadd.f32 %v1647_v18, %v1516_v14 }
 0x1e9   : > { %v1649_v26 = vpop.f32.mrf.mxu0 }
 0x1ea   : > { %v1674_v29 = vadd.f32 %v1667_v21, %v1658_v24  ;;  %v1659_v30 = vadd.f32 %v1649_v26, %v1517_v23 }
 0x1eb   : > { %v1653_v31 = vpop.f32.mrf.mxu0 }
 0x1ec   : > { %v1682_v35 = vmul.f32 0.044715, %v1674_v29  ;;  %v1675_v38 = vadd.f32 %v1667_v21, %v1659_v30  ;;  %v1660_v39 = vadd.f32 %v1653_v31, %v1518_v28  ;;  %v1678_v26 = vmul.f32 0.5, %v1674_v29  ;;  %v2961_v31 = vld [vmem:[%s4935_s4 + $0x18] sm:$0xff] }
 0x1ed   : > { %v1655_v40 = vpop.f32.mrf.mxu0 }
 0x1ee   : > { %v1686_v43 = vmul.f32 %v1682_v35, %v1674_v29  ;;  %v1683_v46 = vmul.f32 0.044715, %v1675_v38  ;;  %v1661_v2 = vadd.f32 %v1655_v40, %v1519_v32  ;;  %v1676_v47 = vadd.f32 %v1672_v12, %v1660_v39  ;;  %v2960_v32 = vld [vmem:[%s4935_s4 + $0x10] sm:$0xff]  ;;  %v2959_v35 = vld [vmem:[%s4935_s4 + $0x8] sm:$0xff] }
 0x1ef   : > { %v1679_v27 = vmul.f32 0.5, %v1675_v38 }
 0x1f0   : > { %v1690_v16 = vmul.f32 %v1686_v43, %v1674_v29  ;;  %v1687_v15 = vmul.f32 %v1683_v46, %v1675_v38  ;;  %v1677_v0 = vadd.f32 %v1672_v12, %v1661_v2  ;;  %v1684_v48 = vmul.f32 0.044715, %v1676_v47 }
 0x1f1   : > { %v1680_v61 = vmul.f32 0.5, %v1676_v47 }
 0x1f2   : > { %v1694_v3 = vadd.f32 %v1690_v16, %v1674_v29  ;;  %v1691_v49 = vmul.f32 %v1687_v15, %v1675_v38  ;;  %v1685_v1 = vmul.f32 0.044715, %v1677_v0  ;;  %v1688_v50 = vmul.f32 %v1684_v48, %v1676_v47  ;;  %v2962_v29 = vld [vmem:[%s4935_s4 + $0x20] sm:$0xf] }
 0x1f3   : > { %v1681_v18 = vmul.f32 0.5, %v1677_v0 }
 0x1f4   : > { %v1695_v4 = vadd.f32 %v1691_v49, %v1675_v38  ;;  %v1689_v5 = vmul.f32 %v1685_v1, %v1677_v0  ;;  %v1698_v51 = vmul.f32 0.7978846, %v1694_v3  ;;  %v1692_v7 = vmul.f32 %v1688_v50, %v1676_v47  ;;  %v2958_v38 = vld [vmem:[%s4935_s4] sm:$0xff]  ;;  %v397_v1 = vld [vmem:[%s4934_s3 + $0x28] sm:$0xff] }
 0x1f6   : > { %v1699_v53 = vmul.f32 0.7978846, %v1695_v4  ;;  %v1693_v8 = vmul.f32 %v1689_v5, %v1677_v0  ;;  %v1696_v9 = vadd.f32 %v1692_v7, %v1676_v47  ;;  %3535 = vtanh.f32 %v1698_v51  ;;  %v398_v7 = vld [vmem:[%s4934_s3 + $0x30] sm:$0xff] }
 0x1f8   : > { %v1697_v54 = vadd.f32 %v1693_v8, %v1677_v0  ;;  %v1700_v55 = vmul.f32 0.7978846, %v1696_v9  ;;  %3537 = vtanh.f32 %v1699_v53 }
 0x1fa   : > { %v1701_v56 = vmul.f32 0.7978846, %v1697_v54  ;;  %3539 = vtanh.f32 %v1700_v55 }
 0x1fc   : > { %3541 = vtanh.f32 %v1701_v56 }
 0x203   : > { %v3536_v57 = vpop.eup %3535 }
 0x204   : > { %v1706_v22 = vadd.f32 1.0, %v3536_v57  ;;  %v399_v57 = vld [vmem:[%s4934_s3 + $0x38] sm:$0xff] }
 0x205   : > { %v3538_v58 = vpop.eup %3537 }
 0x206   : > { %v1707_v24 = vadd.f32 1.0, %v3538_v58  ;;  %v4288_v28 = vmul.f32 %v1706_v22, %v1678_v26 }
 0x207   : > { %v3540_v59 = vpop.eup %3539 }
 0x208   : > { %v1708_v14 = vadd.f32 1.0, %v3540_v59  ;;  %v4290_v30 = vmul.f32 %v1707_v24, %v1679_v27  ;;  %v401_v27 = vld [vmem:[%s4934_s3 + $0x48] sm:$0xf] }
 0x209   : > { %v3542_v60 = vpop.eup %3541 }
 0x20a   : > { %v1709_v21 = vadd.f32 1.0, %v3542_v60  ;;  %v4280_v23 = vmul.f32 %v1708_v14, %v1680_v61  ;;  %v400_v14 = vld [vmem:[%s4934_s3 + $0x40] sm:$0xff] }
 0x20c   : > { %v4282_v25 = vmul.f32 %v1709_v21, %v1681_v18  ;;  %1732 = vrot.lane.b32.xlu1 %v4280_v23, %s3571_s19 }
 0x20e   : > { %1736 = vrot.lane.b32.xlu0 %v4282_v25, %s3571_s19 }
 0x210   : > { %1730 = vrot.lane.b32.xlu1 %v4288_v28, %s3571_s19 }
 0x212   : > { %1734 = vrot.lane.b32.xlu0 %v4290_v30, %s3571_s19 }
 0x214   : > { %1982 = vrot.lane.b32.xlu1 %v4280_v23, %s3574_s21 }
 0x216   : > { %1986 = vrot.lane.b32.xlu0 %v4282_v25, %s3574_s21 }
 0x218   : > { %1980 = vrot.lane.b32.xlu1 %v4288_v28, %s3574_s21 }
 0x21a   : > { %1984 = vrot.lane.b32.xlu0 %v4290_v30, %s3574_s21 }
 0x21c   : > { %1716 = vrot.lane.b32.xlu1 %v4280_v23, %s3572_s20 }
 0x21e   : > { %1720 = vrot.lane.b32.xlu0 %v4282_v25, %s3572_s20 }
 0x220   : > { %1714 = vrot.lane.b32.xlu1 %v4288_v28, %s3572_s20 }
 0x222   : > { %1718 = vrot.lane.b32.xlu0 %v4290_v30, %s3572_s20 }
 0x224   : > { %2124 = vrot.lane.b32.xlu1 %v4280_v23, %s3575_s22 }
 0x226   : > { %2126 = vrot.lane.b32.xlu0 %v4290_v30, %s3575_s22 }
 0x228   : > { %2534 = vrot.lane.b32.xlu1 %v4280_v23, %s3577_s24 }
 0x22a   : > { %2128 = vrot.lane.b32.xlu0 %v4282_v25, %s3575_s22 }
 0x22c   : > { %2122 = vrot.lane.b32.xlu1 %v4288_v28, %s3575_s22 }
 0x22e   : > { %2538 = vrot.lane.b32.xlu0 %v4282_v25, %s3577_s24 }
 0x230   : > { %2532 = vrot.lane.b32.xlu1 %v4288_v28, %s3577_s24 }
 0x232   : > { %2536 = vrot.lane.b32.xlu0 %v4290_v30, %s3577_s24 }
 0x234   : > { %2392 = vrot.lane.b32.xlu1 %v4280_v23, %s3576_s23 }
 0x236   : > { %2394 = vrot.lane.b32.xlu0 %v4290_v30, %s3576_s23 }
 0x238   : > { %2676 = vrot.lane.b32.xlu1 %v4280_v23, %s3578_s29 }
 0x23a   : > { %2396 = vrot.lane.b32.xlu0 %v4282_v25, %s3576_s23 }
 0x23c   : > { %2390 = vrot.lane.b32.xlu1 %v4288_v28, %s3576_s23 }
 0x23e   : > { %2680 = vrot.lane.b32.xlu0 %v4282_v25, %s3578_s29 }
 0x240   : > { %2674 = vrot.lane.b32.xlu1 %v4288_v28, %s3578_s29 }
 0x242   : > { %2678 = vrot.lane.b32.xlu0 %v4290_v30, %s3578_s29 }
 0x244   : > { %2818 = vrot.lane.b32.xlu1 %v4280_v23, %s3579_s30 }
 0x246   : > { %2822 = vrot.lane.b32.xlu0 %v4282_v25, %s3579_s30 }
 0x248   : > { %2816 = vrot.lane.b32.xlu1 %v4288_v28, %s3579_s30 }
 0x24a   : > { %2820 = vrot.lane.b32.xlu0 %v4290_v30, %s3579_s30 }
 0x24c   : > { %2985 = vperm.xlu1 %3534, %v2962_v29   ;;  %v392_v29 = vld [vmem:[%s4934_s3] sm:$0xff] }
 0x24e   : > { %2980 = vperm.xlu0 %3533, %v2961_v31  }
 0x250   : > { %2975 = vperm.xlu1 %3534, %v2960_v32   ;;  %v402_v32 = vld [vmem:[%s4934_s3 + $0x50] sm:$0xff] }
 0x252   : > { %2970 = vperm.xlu0 %3533, %v2959_v35  }
 0x254   : > { %2965 = vperm.xlu1 %3534, %v2958_v38  }
 0x27e   : > { %v1733_v39 = vpop.permute.xlu1 %1732 }
 0x280   : > { %v1737_v12 = vpop.permute.xlu0 %1736 }
 0x281   : > { %v1739_v40 = vsel %vm508_vm0, %v1733_v39, %v1737_v12  ;;  %v1741_v43 = vsel %vm508_vm0, %v1737_v12, %v1733_v39 }
 0x282   : > { %v1744_v46 = vmul.f32 %v1741_v43, %v3815_v20  ;;  %v1745_v2 = vmul.f32 %v1739_v40, %v3812_v19  ;;  %v1731_v47 = vpop.permute.xlu1 %1730 }
 0x284   : > { %v1735_v16 = vpop.permute.xlu0 %1734  ;;  %3394 = vmatprep.subr.msk.mxu1 %vm1762_vm10, %v1745_v2 }
 0x285   : > { %v1738_v15 = vsel %vm508_vm0, %v1731_v47, %v1735_v16  ;;  %v1740_v0 = vsel %vm508_vm0, %v1735_v16, %v1731_v47  ;;  %3395 = vmatpush1.msk.msra.mxu1 %vm1762_vm10, %v1744_v46  ;;  %v394_v16 = vld [vmem:[%s4934_s3 + $0x10] sm:$0xff] }
 0x286   : > { %v1742_v48 = vmul.f32 %v1740_v0, %v3815_v20  ;;  %v1743_v3 = vmul.f32 %v1738_v15, %v3812_v19  ;;  %v1983_v49 = vpop.permute.xlu1 %1982 }
 0x288   : > { %v1987_v50 = vpop.permute.xlu0 %1986  ;;  %1799 = vmatprep.subr.mxu1 %v1743_v3 }
 0x289   : > { %v1989_v4 = vsel %vm737_vm4, %v1983_v49, %v1987_v50  ;;  %v1991_v5 = vsel %vm737_vm4, %v1987_v50, %v1983_v49  ;;  %1800 = vmatpush1.msra.mxu1 %v1742_v48  ;;  %v396_v50 = vld [vmem:[%s4934_s3 + $0x20] sm:$0xf] }
 0x28a   : > { %v1994_v51 = vmul.f32 %v1991_v5, %v3894_v11  ;;  %v1995_v20 = vmul.f32 %v1989_v4, %v3901_v17  ;;  %3396 = vmatmul.mubr.msk.f32.vlgmr.msra.gmra.mxu1 %vm1746_vm11, %v397_v1  ;;  %v1981_v19 = vpop.permute.xlu1 %1980  ;;  %v405_v4 = vld [vmem:[%s4934_s3 + $0x68] sm:$0xff] }
 0x28b   : > { %1839 = vmatprep.mubr.f32.mxu1 %v4942_v10 }
 0x28c   : > { %v1985_v53 = vpop.permute.xlu0 %1984  ;;  %3408 = vmatprep.subr.msk.mxu1 %vm1762_vm10, %v1995_v20  ;;  %v406_v20 = vld [vmem:[%s4934_s3 + $0x70] sm:$0xf] }
 0x28d   : > { %v1988_v8 = vsel %vm737_vm4, %v1981_v19, %v1985_v53  ;;  %v1990_v9 = vsel %vm737_vm4, %v1985_v53, %v1981_v19  ;;  %3409 = vmatpush1.msk.msra.mxu1 %vm1762_vm10, %v1994_v51  ;;  %v407_v19 = vld [vmem:[%s4934_s3 + $0x78] sm:$0xff] }
 0x28e   : > { %v1992_v54 = vmul.f32 %v1990_v9, %v3894_v11  ;;  %v1993_v55 = vmul.f32 %v1988_v8, %v3901_v17  ;;  %3397 = vmatmul.mubr.msk.f32.gmra.mxu1 %vm1746_vm11, %v398_v7  ;;  %v1717_v56 = vpop.permute.xlu1 %1716 }
 0x28f   : > { %1845 = vmatprep.mubr.f32.mxu1 %v4942_v10 }
 0x290   : > { %v1721_v58 = vpop.permute.xlu0 %1720  ;;  %2047 = vmatprep.subr.mxu1 %v1993_v55 }
 0x291   : > { %v1723_v59 = vsel %vm459_vm2, %v1717_v56, %v1721_v58  ;;  %v1725_v60 = vsel %vm459_vm2, %v1721_v58, %v1717_v56  ;;  %2048 = vmatpush1.msra.mxu1 %v1992_v54 }
 0x292   : > { %v1728_v11 = vmul.f32 %v1725_v60, %v3859_v45  ;;  %v1729_v17 = vmul.f32 %v1723_v59, %v3856_v44  ;;  %3398 = vmatmul.mubr.msk.f32.gmra.mxu1 %vm1746_vm11, %v399_v57  ;;  %3422 = vmatprep.subr.msk.mxu1 %vm1762_vm10, %v4282_v25  ;;  %v1715_v61 = vpop.permute.xlu1 %1714  ;;  %v408_v60 = vld [vmem:[%s4934_s3 + $0x80] sm:$0xff] }
 0x293   : > { %1851 = vmatprep.mubr.f32.mxu1 %v4942_v10 }
 0x294   : > { %v1719_v18 = vpop.permute.xlu0 %1718  ;;  %3401 = vmatprep.subr.msk.mxu0 %vm1762_vm10, %v1729_v17 }
 0x295   : > { %v1722_v21 = vsel %vm459_vm2, %v1715_v61, %v1719_v18  ;;  %v1724_v22 = vsel %vm459_vm2, %v1719_v18, %v1715_v61  ;;  %3402 = vmatpush1.msk.msra.mxu0 %vm1762_vm10, %v1728_v11  ;;  %v412_v11 = vld [vmem:[%s4934_s3 + $0xa0] sm:$0xff] }
 0x296   : > { %v1726_v24 = vmul.f32 %v1724_v22, %v3859_v45  ;;  %v1727_v25 = vmul.f32 %v1722_v21, %v3856_v44  ;;  %3399 = vmatmul.mubr.msk.f32.gmra.mxu1 %vm1746_vm11, %v400_v14  ;;  %v2125_v26 = vpop.permute.xlu1 %2124  ;;  %v393_v45 = vld [vmem:[%s4934_s3 + $0x8] sm:$0xff] }
 0x297   : > { %1857 = vmatprep.mubr.f32.mxu1 %v4942_v10 }
 0x298   : > { %v2127_v31 = vpop.permute.xlu0 %2126  ;;  %1915 = vmatprep.subr.mxu0 %v1727_v25  ;;  %v414_v25 = vld [vmem:[%s4934_s3 + $0xb0] sm:$0xff] }
 0x299   : > { %1916 = vmatpush1.msra.mxu0 %v1726_v24 }
 0x29a   : > { %3400 = vmatmul.mubr.msk.f32.gmra.mxu1 %vm1746_vm11, %v401_v27  ;;  %3403 = vmatmul.mubr.msk.f32.vlgmr.msra.gmra.mxu0 %vm1746_vm11, %v392_v29  ;;  %v2535_v44 = vpop.permute.xlu1 %2534  ;;  %v415_v29 = vld [vmem:[%s4934_s3 + $0xb8] sm:$0xff] }
 0x29b   : > { %1955 = vmatprep.mubr.f32.mxu0 %v4942_v10  ;;  %2081 = vmatprep.mubr.f32.mxu1 %v4942_v10 }
 0x29c   : > { %v2129_v35 = vpop.permute.xlu0 %2128 }
 0x29d   : > { %v2131_v38 = vsel %vm879_vm5, %v2125_v26, %v2129_v35  ;;  %v2133_v39 = vsel %vm879_vm5, %v2129_v35, %v2125_v26  ;;  %v411_v26 = vld [vmem:[%s4934_s3 + $0x98] sm:$0xf] }
 0x29e   : > { %v2136_v12 = vmul.f32 %v2133_v39, %v3996_v33  ;;  %v2137_v40 = vmul.f32 %v2131_v38, %v3999_v34  ;;  %3404 = vmatmul.mubr.msk.f32.gmra.mxu0 %vm1746_vm11, %v393_v45  ;;  %3410 = vmatmul.mubr.msk.f32.vlgmr.msra.gmra.mxu1 %vm1746_vm11, %v402_v32  ;;  %v2123_v43 = vpop.permute.xlu1 %2122  ;;  %v417_v32 = vld [vmem:[%s4934_s3 + $0xc8] sm:$0xff]  ;;  %v416_v38 = vld [vmem:[%s4934_s3 + $0xc0] sm:$0xf] }
 0x29f   : > { %3423 = vmatpush1.msk.msra.mxu1 %vm1762_vm10, %v4280_v23  ;;  %1961 = vmatprep.mubr.f32.mxu0 %v4942_v10  ;;  %v2130_v46 = vsel %vm879_vm5, %v2123_v43, %v2127_v31  ;;  %v2132_v2 = vsel %vm879_vm5, %v2127_v31, %v2123_v43  ;;  %v403_v23 = vld [vmem:[%s4934_s3 + $0x58] sm:$0xff] }
 0x2a0   : > { %2315 = vmatprep.subr.mxu1 %v4290_v30  ;;  %v2539_v47 = vpop.permute.xlu0 %2538  ;;  %3415 = vmatprep.subr.msk.mxu0 %vm1762_vm10, %v2137_v40  ;;  %v2134_v15 = vmul.f32 %v2132_v2, %v3996_v33  ;;  %v2135_v0 = vmul.f32 %v2130_v46, %v3999_v34  ;;  %v395_v34 = vld [vmem:[%s4934_s3 + $0x18] sm:$0xff]  ;;  %v418_v46 = vld [vmem:[%s4934_s3 + $0xd0] sm:$0xff] }
 0x2a1   : > { %v2543_v48 = vsel %vm1256_vm7, %v2539_v47, %v2535_v44  ;;  %2316 = vmatpush1.msra.mxu1 %v4288_v28  ;;  %2087 = vmatprep.mubr.f32.mxu1 %v4942_v10  ;;  %v404_v28 = vld [vmem:[%s4934_s3 + $0x60] sm:$0xff]  ;;  %v2541_v54 = vsel %vm1256_vm7, %v2535_v44, %v2539_v47  ;;  %v419_v47 = vld [vmem:[%s4934_s3 + $0xd8] sm:$0xff] }
 0x2a2   : > { %v2547_v30 = vmul.f32 %v2543_v48, %v4103_v37  ;;  %3416 = vmatpush1.msk.msra.mxu0 %vm1762_vm10, %v2136_v12  ;;  %3411 = vmatmul.mubr.msk.f32.gmra.mxu1 %vm1746_vm11, %v403_v23  ;;  %v2533_v3 = vpop.permute.xlu1 %2532  ;;  %v2546_v21 = vmul.f32 %v2541_v54, %v4100_v36  ;;  %v421_v48 = vld [vmem:[%s4934_s3 + $0xe8] sm:$0xf] }
 0x2a3   : > { %3405 = vmatmul.mubr.msk.f32.gmra.mxu0 %vm1746_vm11, %v394_v16  ;;  %2189 = vmatprep.subr.mxu0 %v2135_v0  ;;  %v423_v16 = vld [vmem:[%s4934_s3 + $0xf8] sm:$0xff]  ;;  %v424_v0 = vld [vmem:[%s4934_s3 + $0x100] sm:$0xff] }
 0x2a4   : > { %v2537_v33 = vpop.permute.xlu0 %2536  ;;  %3436 = vmatprep.subr.msk.mxu1 %vm1762_vm10, %v2547_v30  ;;  %2190 = vmatpush1.msra.mxu0 %v2134_v15  ;;  %v420_v15 = vld [vmem:[%s4934_s3 + $0xe0] sm:$0xff]  ;;  %v425_v30 = vld [vmem:[%s4934_s3 + $0x108] sm:$0xff] }
 0x2a5   : > { %1967 = vmatprep.mubr.f32.mxu0 %v4942_v10  ;;  %2093 = vmatprep.mubr.f32.mxu1 %v4942_v10  ;;  %v2542_v56 = vsel %vm1256_vm7, %v2537_v33, %v2533_v3  ;;  %v2540_v17 = vsel %vm1256_vm7, %v2533_v3, %v2537_v33  ;;  %v427_v3 = vld [vmem:[%s4934_s3 + $0x118] sm:$0xff]  ;;  %v426_v33 = vld [vmem:[%s4934_s3 + $0x110] sm:$0xf] }
 0x2a6   : > { %3412 = vmatmul.mubr.msk.f32.gmra.mxu1 %vm1746_vm11, %v404_v28  ;;  %v2393_v49 = vpop.permute.xlu1 %2392  ;;  %v2545_v24 = vmul.f32 %v2542_v56, %v4103_v37  ;;  %v413_v37 = vld [vmem:[%s4934_s3 + $0xa8] sm:$0xff] }
 0x2a7   : > { %3406 = vmatmul.mubr.msk.f32.gmra.mxu0 %vm1746_vm11, %v395_v34  ;;  %2099 = vmatprep.mubr.f32.mxu1 %v4942_v10 }
 0x2a8   : > { %v2395_v1 = vpop.permute.xlu0 %2394  ;;  %1973 = vmatprep.mubr.f32.mxu0 %v4942_v10 }
 0x2aa   : > { %3413 = vmatmul.mubr.msk.f32.gmra.mxu1 %vm1746_vm11, %v405_v4  ;;  %v2677_v5 = vpop.permute.xlu1 %2676  ;;  %v430_v4 = vld [vmem:[%s4934_s3 + $0x130] sm:$0xff] }
 0x2ab   : > { %3407 = vmatmul.mubr.msk.f32.gmra.mxu0 %vm1746_vm11, %v396_v50  ;;  %2105 = vmatprep.mubr.f32.mxu1 %v4942_v10 }
 0x2ac   : > { %v2397_v51 = vpop.permute.xlu0 %2396  ;;  %2223 = vmatprep.mubr.f32.mxu0 %v4942_v10 }
 0x2ad   : > { %v2399_v7 = vsel %vm1114_vm6, %v2393_v49, %v2397_v51  ;;  %v2401_v53 = vsel %vm1114_vm6, %v2397_v51, %v2393_v49 }
 0x2ae   : > { %v2404_v8 = vmul.f32 %v2399_v7, %v4070_v62  ;;  %v2405_v9 = vmul.f32 %v2401_v53, %v4073_v63  ;;  %3414 = vmatmul.mubr.msk.f32.gmra.mxu1 %vm1746_vm11, %v406_v20  ;;  %v2391_v55 = vpop.permute.xlu1 %2390  ;;  %v434_v53 = vld [vmem:[%s4934_s3 + $0x150] sm:$0xff] }
 0x2af   : > { %3417 = vmatmul.mubr.msk.f32.vlgmr.msra.gmra.mxu0 %vm1746_vm11, %v407_v19  ;;  %v2398_v57 = vsel %vm1114_vm6, %v2391_v55, %v2395_v1  ;;  %v2400_v58 = vsel %vm1114_vm6, %v2395_v1, %v2391_v55  ;;  %2349 = vmatprep.mubr.f32.mxu1 %v4942_v10  ;;  %v428_v1 = vld [vmem:[%s4934_s3 + $0x120] sm:$0xff]  ;;  %v429_v19 = vld [vmem:[%s4934_s3 + $0x128] sm:$0xff] }
 0x2b0   : > { %v2681_v59 = vpop.permute.xlu0 %2680  ;;  %3429 = vmatprep.subr.msk.mxu0 %vm1762_vm10, %v2405_v9  ;;  %2229 = vmatprep.mubr.f32.mxu0 %v4942_v10  ;;  %v2402_v61 = vmul.f32 %v2398_v57, %v4070_v62  ;;  %v2403_v14 = vmul.f32 %v2400_v58, %v4073_v63  ;;  %v2544_v62 = vmul.f32 %v2540_v17, %v4100_v36  ;;  %v409_v63 = vld [vmem:[%s4934_s3 + $0x88] sm:$0xff]  ;;  %v410_v36 = vld [vmem:[%s4934_s3 + $0x90] sm:$0xff]  ;;  %v436_v9 = vld [vmem:[%s4934_s3 + $0x160] sm:$0xf] }
 0x2b1   : > { %v2685_v18 = vsel %vm1398_vm8, %v2681_v59, %v2677_v5  ;;  %3430 = vmatpush1.msk.msra.mxu0 %vm1762_vm10, %v2404_v8  ;;  %v2683_v31 = vsel %vm1398_vm8, %v2677_v5, %v2681_v59  ;;  %v435_v8 = vld [vmem:[%s4934_s3 + $0x158] sm:$0xff] }
 0x2b2   : > { %v2689_v22 = vmul.f32 %v2685_v18, %v4171_v42  ;;  %3424 = vmatmul.mubr.msk.f32.vlgmr.msra.gmra.mxu1 %vm1746_vm11, %v412_v11  ;;  %2457 = vmatprep.subr.mxu0 %v2403_v14  ;;  %v2675_v44 = vpop.permute.xlu1 %2674  ;;  %v2688_v39 = vmul.f32 %v2683_v31, %v4168_v41 }
 0x2b3   : > { %3418 = vmatmul.mubr.msk.f32.gmra.mxu0 %vm1746_vm11, %v408_v60  ;;  %3437 = vmatpush1.msk.msra.mxu1 %vm1762_vm10, %v2546_v21 }
 0x2b4   : > { %2458 = vmatpush1.msra.mxu0 %v2402_v61  ;;  %2599 = vmatprep.subr.mxu1 %v2545_v24  ;;  %v2679_v27 = vpop.permute.xlu0 %2678 }
 0x2b5   : > { %2600 = vmatpush1.msra.mxu1 %v2544_v62  ;;  %3443 = vmatprep.subr.msk.mxu0 %vm1762_vm10, %v2689_v22  ;;  %v2684_v45 = vsel %vm1398_vm8, %v2679_v27, %v2675_v44  ;;  %v2682_v35 = vsel %vm1398_vm8, %v2675_v44, %v2679_v27 }
 0x2b6   : > { %2235 = vmatprep.mubr.f32.mxu0 %v4942_v10  ;;  %2355 = vmatprep.mubr.f32.mxu1 %v4942_v10  ;;  %v2687_v12 = vmul.f32 %v2684_v45, %v4171_v42  ;;  %v2686_v40 = vmul.f32 %v2682_v35, %v4168_v41  ;;  %v422_v42 = vld [vmem:[%s4934_s3 + $0xf0] sm:$0xff]  ;;  %v2819_v2 = vpop.permute.xlu1 %2818 }
 0x2b7   : > { %3509 = vmatprep.subr.msk.mxu1 %vm1762_vm10, %v2689_v22  ;;  %3419 = vmatmul.mubr.msk.f32.gmra.mxu0 %vm1746_vm11, %v409_v63 }
 0x2b8   : > { %3425 = vmatmul.mubr.msk.f32.gmra.mxu1 %vm1746_vm11, %v413_v37  ;;  %2241 = vmatprep.mubr.f32.mxu0 %v4942_v10  ;;  %v2823_v43 = vpop.permute.xlu0 %2822 }
 0x2b9   : > { %2361 = vmatprep.mubr.f32.mxu1 %v4942_v10  ;;  %v2827_v41 = vsel %vm1540_vm9, %v2823_v43, %v2819_v2  ;;  %v2825_v28 = vsel %vm1540_vm9, %v2819_v2, %v2823_v43 }
 0x2ba   : > { %v2831_v23 = vmul.f32 %v4208_v52, %v2827_v41  ;;  %v2817_v49 = vpop.permute.xlu1 %2816  ;;  %v2830_v51 = vmul.f32 %v4203_v6, %v2825_v28 }
 0x2bb   : > { %3420 = vmatmul.mubr.msk.f32.gmra.mxu0 %vm1746_vm11, %v410_v36 }
 0x2bc   : > { %3426 = vmatmul.mubr.msk.f32.gmra.mxu1 %vm1746_vm11, %v414_v25  ;;  %2247 = vmatprep.mubr.f32.mxu0 %v4942_v10  ;;  %v2821_v34 = vpop.permute.xlu0 %2820 }
 0x2bd   : > { %2367 = vmatprep.mubr.f32.mxu1 %v4942_v10  ;;  %v2826_v50 = vsel %vm1540_vm9, %v2821_v34, %v2817_v49  ;;  %v2824_v5 = vsel %vm1540_vm9, %v2817_v49, %v2821_v34 }
 0x2be   : > { %v2829_v20 = vmul.f32 %v4208_v52, %v2826_v50  ;;  %v2828_v7 = vmul.f32 %v4203_v6, %v2824_v5  ;;  %v432_v6 = vld [vmem:[%s4934_s3 + $0x140] sm:$0xff]  ;;  %v433_v52 = vld [vmem:[%s4934_s3 + $0x148] sm:$0xff] }
 0x2bf   : > { %3421 = vmatmul.mubr.msk.f32.gmra.mxu0 %vm1746_vm11, %v411_v26 }
 0x2c0   : > { %3427 = vmatmul.mubr.msk.f32.gmra.mxu1 %vm1746_vm11, %v415_v29  ;;  %2491 = vmatprep.mubr.f32.mxu0 %v4942_v10 }
 0x2c1   : > { %2373 = vmatprep.mubr.f32.mxu1 %v4942_v10 }
 0x2c3   : > { %3431 = vmatmul.mubr.msk.f32.vlgmr.msra.gmra.mxu0 %vm1746_vm11, %v417_v32 }
 0x2c4   : > { %3428 = vmatmul.mubr.msk.f32.gmra.mxu1 %vm1746_vm11, %v416_v38  ;;  %3444 = vmatpush1.msk.msra.mxu0 %vm1762_vm10, %v2688_v39 }
 0x2c5   : > { %2741 = vmatprep.subr.mxu0 %v2687_v12  ;;  %2497 = vmatprep.mubr.f32.mxu0 %v4942_v10 }
 0x2c6   : > { %2742 = vmatpush1.msra.mxu0 %v2686_v40  ;;  %2633 = vmatprep.mubr.f32.mxu1 %v4942_v10 }
 0x2c7   : > { %3432 = vmatmul.mubr.msk.f32.gmra.mxu0 %vm1746_vm11, %v418_v46  ;;  %3479 = vmatprep.subr.mxu0 %v4942_v10 }
 0x2c8   : > { %3438 = vmatmul.mubr.msk.f32.vlgmr.msra.gmra.mxu1 %vm1746_vm11, %v422_v42  ;;  %2503 = vmatprep.mubr.f32.mxu0 %v4942_v10 }
 0x2c9   : > { %3511 = vmatpush1.msk.msra.mxu1 %vm1762_vm10, %v2688_v39  ;;  %2639 = vmatprep.mubr.f32.mxu1 %v4942_v10 }
 0x2ca   : > { %3510 = vmatprep.subr.mxu1 %v2687_v12 }
 0x2cb   : > { %3512 = vmatpush1.msra.mxu1 %v2686_v40  ;;  %3433 = vmatmul.mubr.msk.f32.gmra.mxu0 %vm1746_vm11, %v419_v47 }
 0x2cc   : > { %3450 = vmatprep.subr.msk.mxu1 %vm1762_vm10, %v2831_v23  ;;  %3439 = vmatmul.mubr.msk.f32.gmra.mxu1 %vm1746_vm11, %v423_v16 }
 0x2cd   : > { %2509 = vmatprep.mubr.f32.mxu0 %v4942_v10  ;;  %2645 = vmatprep.mubr.f32.mxu1 %v4942_v10 }
 0x2cf   : > { %3434 = vmatmul.mubr.msk.f32.gmra.mxu0 %vm1746_vm11, %v420_v15 }
 0x2d0   : > { %3440 = vmatmul.mubr.msk.f32.gmra.mxu1 %vm1746_vm11, %v424_v0  ;;  %2515 = vmatprep.mubr.f32.mxu0 %v4942_v10 }
 0x2d1   : > { %2651 = vmatprep.mubr.f32.mxu1 %v4942_v10 }
 0x2d3   : > { %3435 = vmatmul.mubr.msk.f32.gmra.mxu0 %vm1746_vm11, %v421_v48 }
 0x2d4   : > { %3441 = vmatmul.mubr.msk.f32.gmra.mxu1 %vm1746_vm11, %v425_v30  ;;  %2775 = vmatprep.mubr.f32.mxu0 %v4942_v10 }
 0x2d5   : > { %2657 = vmatprep.mubr.f32.mxu1 %v4942_v10 }
 0x2d7   : > { %3445 = vmatmul.mubr.msk.f32.vlgmr.msra.gmra.mxu0 %vm1746_vm11, %v427_v3 }
 0x2d8   : > { %3442 = vmatmul.mubr.msk.f32.gmra.mxu1 %vm1746_vm11, %v426_v33  ;;  %2781 = vmatprep.mubr.f32.mxu0 %v4942_v10 }
 0x2d9   : > { %2793 = vmatprep.mubr.f32.mxu1 %v4942_v10 }
 0x2db   : > { %3446 = vmatmul.mubr.msk.f32.gmra.mxu0 %vm1746_vm11, %v428_v1 }
 0x2dc   : > { %3448 = vmatmul.mubr.msk.f32.vlgmr.msra.gmra.mxu1 %vm1746_vm11, %v430_v4  ;;  %2787 = vmatprep.mubr.f32.mxu0 %v4942_v10 }
 0x2dd   : > { %3451 = vmatpush1.msk.msra.mxu1 %vm1762_vm10, %v2830_v51  ;;  %2799 = vmatprep.mubr.f32.mxu1 %v4942_v10 }
 0x2de   : > { %2883 = vmatprep.subr.mxu1 %v2829_v20 }
 0x2df   : > { %2884 = vmatpush1.msra.mxu1 %v2828_v7  ;;  %3447 = vmatmul.mubr.msk.f32.gmra.mxu0 %vm1746_vm11, %v429_v19 }
 0x2e0   : > { %3449 = vmatmul.mubr.msk.f32.gmra.mxu1 %vm1746_vm11, %v431_v13 }
 0x2e1   : > { %2917 = vmatprep.mubr.f32.mxu1 %v4942_v10 }
 0x2e4   : > { %3452 = vmatmul.mubr.msk.f32.vlgmr.msra.gmra.mxu1 %vm1746_vm11, %v432_v6 }
 0x2e5   : > { %2923 = vmatprep.mubr.f32.mxu1 %v4942_v10 }
 0x2e8   : > { %3453 = vmatmul.mubr.msk.f32.gmra.mxu1 %vm1746_vm11, %v433_v52 }
 0x2e9   : > { %2929 = vmatprep.mubr.f32.mxu1 %v4942_v10 }
 0x2ec   : > { %3454 = vmatmul.mubr.msk.f32.gmra.mxu1 %vm1746_vm11, %v434_v53 }
 0x2ed   : > { %2935 = vmatprep.mubr.f32.mxu1 %v4942_v10 }
 0x2f0   : > { %3455 = vmatmul.mubr.msk.f32.gmra.mxu1 %vm1746_vm11, %v435_v8 }
 0x2f1   : > { %2941 = vmatprep.mubr.f32.mxu1 %v4942_v10 }
 0x2f4   : > { %3456 = vmatmul.mubr.msk.f32.gmra.mxu1 %vm1746_vm11, %v436_v9 }
 0x34a   : > { %v1835_v54 = vpop.f32.mrf.mxu1 }
 0x34c   : > { %v1837_v55 = vpop.f32.mrf.mxu1 }
 0x34e   : > { %v1841_v56 = vpop.f32.mrf.mxu1 }
 0x350   : > { %v1843_v57 = vpop.f32.mrf.mxu1 }
 0x352   : > { %v1847_v58 = vpop.f32.mrf.mxu1 }
 0x354   : > { %v1849_v59 = vpop.f32.mrf.mxu1 }
 0x356   : > { %v4711_v60 = vpop.f32.mrf.mxu1 }
 0x358   : > { %v4713_v11 = vpop.f32.mrf.mxu1 }
 0x35a   : > { %v4715_v17 = vpop.f32.mrf.mxu1  ;;  %v1951_v61 = vpop.f32.mrf.mxu0 }
 0x35b   : > { %v1952_v21 = vadd.f32 %v1951_v61, %v1835_v54 }
 0x35c   : > { %v4717_v14 = vpop.f32.mrf.mxu1  ;;  %v1953_v18 = vpop.f32.mrf.mxu0 }
 0x35d   : > { %v1954_v62 = vadd.f32 %v1953_v18, %v1837_v55 }
 0x35e   : > { %v1957_v22 = vpop.f32.mrf.mxu0  ;;  %v2083_v24 = vpop.f32.mrf.mxu1 }
 0x35f   : > { %v4719_v63 = vadd.f32 %v2083_v24, %v1952_v21  ;;  %v1958_v26 = vadd.f32 %v1957_v22, %v1841_v56 }
 0x360   : > { %v1959_v37 = vpop.f32.mrf.mxu0  ;;  %v2085_v36 = vpop.f32.mrf.mxu1 }
 0x361   : > { %v4721_v25 = vadd.f32 %v2085_v36, %v1954_v62  ;;  %v1960_v31 = vadd.f32 %v1959_v37, %v1843_v57 }
 0x362   : > { %v2089_v29 = vpop.f32.mrf.mxu1 }
 0x363   : > { %v1963_v27 = vpop.f32.mrf.mxu0  ;;  %v4723_v44 = vadd.f32 %v2089_v29, %v1958_v26 }
 0x364   : > { %v2091_v32 = vpop.f32.mrf.mxu1  ;;  %v1964_v35 = vadd.f32 %v1963_v27, %v1847_v58 }
 0x365   : > { %v1965_v45 = vpop.f32.mrf.mxu0  ;;  %v4725_v38 = vadd.f32 %v2091_v32, %v1960_v31 }
 0x366   : > { %v2095_v12 = vpop.f32.mrf.mxu1  ;;  %v1966_v40 = vadd.f32 %v1965_v45, %v1849_v59 }
 0x367   : > { %v1969_v39 = vpop.f32.mrf.mxu0  ;;  %v4727_v43 = vadd.f32 %v2095_v12, %v1964_v35 }
 0x368   : > { %v2097_v42 = vpop.f32.mrf.mxu1  ;;  %v1970_v10 = vadd.f32 %v1969_v39, %v4711_v60 }
 0x369   : > { %v1971_v46 = vpop.f32.mrf.mxu0  ;;  %v4729_v2 = vadd.f32 %v2097_v42, %v1966_v40 }
 0x36a   : > { %v2101_v47 = vpop.f32.mrf.mxu1 }
 0x36b   : > { %v1975_v41 = vpop.f32.mrf.mxu0 }
 0x36c   : > { %v2103_v23 = vpop.f32.mrf.mxu1 }
 0x36d   : > { %v1977_v16 = vpop.f32.mrf.mxu0 }
 0x36e   : > { %v2107_v15 = vpop.f32.mrf.mxu1 }
 0x36f   : > { %v4731_v0 = vpop.f32.mrf.mxu0 }
 0x370   : > { %v4733_v48 = vpop.f32.mrf.mxu1 }
 0x371   : > { %v2227_v30 = vpop.f32.mrf.mxu0 }
 0x372   : > { %v4737_v33 = vpop.f32.mrf.mxu1  ;;  %v2255_v60 = vadd.f32 %v2227_v30, %v4721_v25 }
 0x373   : > { %v4735_v3 = vpop.f32.mrf.mxu0 }
 0x374   : > { %v2353_v28 = vpop.f32.mrf.mxu1 }
 0x375   : > { %v4739_v34 = vpop.f32.mrf.mxu0 }
 0x376   : > { %4944 = vst [vmem:[#allocation2_spill] sm:$0xff] %v4739_v34 }
 0x377   : > { %v4741_v49 = vpop.f32.mrf.mxu0 }
 0x378   : > { %v4743_v1 = vpop.f32.mrf.mxu1 }
 0x379   : > { %4945 = vst [vmem:[#allocation3_spill] sm:$0xff] %v4743_v1  ;;  %v4745_v50 = vpop.f32.mrf.mxu0  ;;  %v1976_v1 = vadd.f32 %v1975_v41, %v4715_v17 }
 0x37a   : > { %v4747_v4 = vpop.f32.mrf.mxu1 }
 0x37b   : > { %4946 = vst [vmem:[#allocation4_spill] sm:$0xff] %v4747_v4  ;;  %v2243_v5 = vpop.f32.mrf.mxu0 }
 0x37c   : > { %v4749_v51 = vpop.f32.mrf.mxu1 }
 0x37d   : > { %4947 = vst [vmem:[#allocation5_spill] sm:$0xff] %v4749_v51  ;;  %v2245_v20 = vpop.f32.mrf.mxu0 }
 0x37e   : > { %v4751_v19 = vpop.f32.mrf.mxu1 }
 0x37f   : > { %v2249_v7 = vpop.f32.mrf.mxu0 }
 0x380   : > { %v2369_v13 = vpop.f32.mrf.mxu1 }
 0x381   : > { %v2251_v6 = vpop.f32.mrf.mxu0 }
 0x382   : > { %v2371_v52 = vpop.f32.mrf.mxu1 }
 0x383   : > { %v2493_v53 = vpop.f32.mrf.mxu0 }
 0x384   : > { %v2375_v8 = vpop.f32.mrf.mxu1 }
 0x385   : > { %v2495_v9 = vpop.f32.mrf.mxu0 }
 0x386   : > { %v2377_v54 = vpop.f32.mrf.mxu1 }
 0x387   : > { %v4753_v55 = vpop.f32.mrf.mxu0 }
 0x388   : > { %4948 = vst [vmem:[#allocation6_spill] sm:$0xff] %v4753_v55  ;;  %v4755_v56 = vpop.f32.mrf.mxu1  ;;  %v1972_v55 = vadd.f32 %v1971_v46, %v4713_v11  ;;  %v2381_v46 = vadd.f32 %v2353_v28, %v2255_v60 }
 0x389   : > { %v4757_v57 = vpop.f32.mrf.mxu0 }
 0x38a   : > { %4949 = vst [vmem:[#allocation7_spill] sm:$0xff] %v4757_v57  ;;  %v2637_v58 = vpop.f32.mrf.mxu1 }
 0x38b   : > { %v4759_v59 = vpop.f32.mrf.mxu0 }
 0x38c   : > { %4950 = vst [vmem:[#allocation8_spill] sm:$0xff] %v4759_v59  ;;  %v4761_v61 = vpop.f32.mrf.mxu1 }
 0x38d   : > { %4951 = vst [vmem:[#allocation9_spill] sm:$0xff] %v4761_v61  ;;  %v4763_v18 = vpop.f32.mrf.mxu0 }
 0x38e   : > { %4952 = vst [vmem:[#allocation10_spill] sm:$0xff] %v4763_v18  ;;  %v4765_v21 = vpop.f32.mrf.mxu1  ;;  %v1978_v18 = vadd.f32 %v1977_v16, %v4717_v14 }
 0x38f   : > { %4953 = vst [vmem:[#allocation11_spill] sm:$0xff] %v4765_v21  ;;  %v2511_v22 = vpop.f32.mrf.mxu0 }
 0x390   : > { %v4767_v24 = vpop.f32.mrf.mxu1  ;;  %v2121_v11 = vadd.f32 %v4733_v48, %v1978_v18 }
 0x391   : > { %4954 = vst [vmem:[#allocation12_spill] sm:$0xff] %v4767_v24  ;;  %v2513_v37 = vpop.f32.mrf.mxu0  ;;  %v2118_v24 = vadd.f32 %v2101_v47, %v1970_v10  ;;  %v2254_v10 = vadd.f32 %v4731_v0, %v4719_v63  ;;  %v2256_v63 = vadd.f32 %v4735_v3, %v4723_v44  ;;  %v2259_v0 = vadd.f32 %v4745_v50, %v4729_v2 }
 0x392   : > { %v4769_v62 = vpop.f32.mrf.mxu1  ;;  %v2263_v25 = vadd.f32 %v2251_v6, %v2121_v11 }
 0x393   : > { %4955 = vst [vmem:[#allocation13_spill] sm:$0xff] %v4769_v62  ;;  %v2517_v27 = vpop.f32.mrf.mxu0  ;;  %v2119_v62 = vadd.f32 %v2103_v23, %v1972_v55  ;;  %v2260_v59 = vadd.f32 %v2243_v5, %v2118_v24  ;;  %v2380_v23 = vadd.f32 %v4737_v33, %v2254_v10 }
 0x394   : > { %v2653_v36 = vpop.f32.mrf.mxu1  ;;  %v2389_v28 = vadd.f32 %v2377_v54, %v2263_v25  ;;  %v4958_v54 = vld [vmem:[#allocation2_spill] sm:$0xff] }
 0x395   : > { %v2519_v45 = vpop.f32.mrf.mxu0  ;;  %v2261_v39 = vadd.f32 %v2245_v20, %v2119_v62  ;;  %v2386_v34 = vadd.f32 %v2369_v13, %v2260_v59  ;;  %v2522_v48 = vadd.f32 %v2493_v53, %v2380_v23  ;;  %v4960_v62 = vld [vmem:[#allocation10_spill] sm:$0xff] }
 0x396   : > { %v2655_v26 = vpop.f32.mrf.mxu1  ;;  %v2531_v44 = vadd.f32 %v2519_v45, %v2389_v28  ;;  %v2981_v45 = vpop.permute.xlu0 %2980 }
 0x397   : > { %v2777_v12 = vpop.f32.mrf.mxu0  ;;  %v2387_v47 = vadd.f32 %v2371_v52, %v2261_v39  ;;  %v2528_v14 = vadd.f32 %v2511_v22, %v2386_v34  ;;  %v2664_v59 = vadd.f32 %v4755_v56, %v2522_v48  ;;  %v4959_v22 = vld [vmem:[#allocation5_spill] sm:$0xff] }
 0x398   : > { %v2659_v29 = vpop.f32.mrf.mxu1  ;;  %v4968_v25 = vld [vmem:[#allocation12_spill] sm:$0xff] }
 0x399   : > { %v2779_v61 = vpop.f32.mrf.mxu0  ;;  %v2529_v5 = vadd.f32 %v2513_v37, %v2387_v47  ;;  %v2670_v20 = vadd.f32 %v2653_v36, %v2528_v14  ;;  %v4967_v14 = vld [vmem:[#allocation7_spill] sm:$0xff] }
 0x39a   : > { %v2661_v31 = vpop.f32.mrf.mxu1 }
 0x39b   : > { %v4778_v4 = vpop.f32.mrf.mxu0  ;;  %v2671_v52 = vadd.f32 %v2655_v26, %v2529_v5  ;;  %v2673_v36 = vadd.f32 %v2661_v31, %v2531_v44  ;;  %v4971_v44 = vld [vmem:[#allocation9_spill] sm:$0xff] }
 0x39c   : > { %v2795_v32 = vpop.f32.mrf.mxu1 }
 0x39d   : > { %v4791_v16 = vpop.f32.mrf.mxu0  ;;  %v2812_v33 = vadd.f32 %v2795_v32, %v2670_v20  ;;  %v4961_v32 = vld [vmem:[#allocation4_spill] sm:$0xff] }
 0x39e   : > { %v2797_v35 = vpop.f32.mrf.mxu1 }
 0x39f   : > { %v2789_v6 = vpop.f32.mrf.mxu0  ;;  %v2813_v50 = vadd.f32 %v2797_v35, %v2671_v52  ;;  %v4970_v52 = vld [vmem:[#allocation11_spill] sm:$0xff] }
 0x3a0   : > { %v2801_v40 = vpop.f32.mrf.mxu1 }
 0x3a2   : > { %v4771_v42 = vpop.f32.mrf.mxu1 }
 0x3a3   : > { %4956 = vst [vmem:[#allocation14_spill] sm:$0xff] %v4771_v42  ;;  %v2120_v42 = vadd.f32 %v2107_v15, %v1976_v1  ;;  %v2523_v1 = vadd.f32 %v2495_v9, %v2381_v46  ;;  %v2385_v9 = vadd.f32 %v4751_v19, %v2259_v0  ;;  %v2791_v19 = vpop.f32.mrf.mxu0 }
 0x3a4   : > { %v4774_v21 = vpop.f32.mrf.mxu1 }
 0x3a5   : > { %4957 = vst [vmem:[#allocation15_spill] sm:$0xff] %v4774_v21  ;;  %v4784_v21 = vpop.permute.xlu1 %2985  ;;  %v2262_v41 = vadd.f32 %v2249_v7, %v2120_v42  ;;  %v2665_v7 = vadd.f32 %v2637_v58, %v2523_v1  ;;  %v2257_v58 = vadd.f32 %v4958_v54, %v4725_v38  ;;  %v2527_v37 = vadd.f32 %v4960_v62, %v2385_v9  ;;  %v4963_v42 = vld [vmem:[#allocation13_spill] sm:$0xff] }
 0x3a6   : > { %v2921_v57 = vpop.f32.mrf.mxu1 }
 0x3a7   : > { %v2388_v30 = vadd.f32 %v2375_v8, %v2262_v41  ;;  %v2258_v8 = vadd.f32 %v4741_v49, %v4727_v43  ;;  %v2807_v2 = vadd.f32 %v2779_v61, %v2665_v7  ;;  %v2806_v43 = vadd.f32 %v2777_v12, %v2664_v59  ;;  %v4962_v61 = vld [vmem:[#allocation8_spill] sm:$0xff]  ;;  %v4969_v7 = vld [vmem:[#allocation6_spill] sm:$0xff] }
 0x3a8   : > { %v4781_v51 = vpop.f32.mrf.mxu1  ;;  %v2669_v60 = vadd.f32 %v4963_v42, %v2527_v37 }
 0x3a9   : > { %v2530_v13 = vadd.f32 %v2517_v27, %v2388_v30  ;;  %v2976_v55 = vpop.permute.xlu1 %2975  ;;  %v2384_v24 = vadd.f32 %v4959_v22, %v2258_v8  ;;  %v2949_v27 = vadd.f32 %v2921_v57, %v2807_v2  ;;  %v4966_v57 = vld [vmem:[#allocation3_spill] sm:$0xff]  ;;  %v2971_v22 = vpop.permute.xlu0 %2970 }
 0x3aa   : > { %v4789_v17 = vpop.f32.mrf.mxu1  ;;  %v4964_v39 = vld [vmem:[#allocation14_spill] sm:$0xff]  ;;  %v2382_v47 = vadd.f32 %v4966_v57, %v2256_v63  ;;  %v2811_v1 = vadd.f32 %v2791_v19, %v2669_v60 }
 0x3ab   : > { %v2672_v18 = vadd.f32 %v2659_v29, %v2530_v13  ;;  %v2383_v29 = vadd.f32 %v4961_v32, %v2257_v58  ;;  %v2526_v35 = vadd.f32 %v4962_v61, %v2384_v24  ;;  %v2815_v38 = vadd.f32 %v4964_v39, %v2673_v36  ;;  %v3020_v32 = vld [vmem:[%s4936_s5] sm:$0x3] }
 0x3ac   : > { %v4794_v15 = vpop.f32.mrf.mxu1  ;;  %v4965_v11 = vld [vmem:[#allocation15_spill] sm:$0xff]  ;;  %v2524_v13 = vadd.f32 %v4969_v7, %v2382_v47  ;;  %v3099_v39 = vld [vmem:[%s4938_s7] sm:$0xff] }
 0x3ad   : > { %v2814_v49 = vadd.f32 %v2801_v40, %v2672_v18  ;;  %v2948_v46 = vadd.f32 %v4965_v11, %v2806_v43  ;;  %v2966_v40 = vpop.permute.xlu1 %2965  ;;  %v2525_v23 = vadd.f32 %v4967_v14, %v2383_v29  ;;  %v2668_v30 = vadd.f32 %v4968_v25, %v2526_v35  ;;  %v3021_v29 = vld [vmem:[%s4937_s6] sm:$0x3]  ;;  %v3102_v11 = vld [vmem:[%s4938_s7 + $0x18] sm:$0xff]  ;;  %v3105_v14 = vld [vmem:[%s4939_s8 + $0x8] sm:$0xff] }
 0x3ae   : > { %v2933_v34 = vpop.f32.mrf.mxu1  ;;  %v4820_v20 = vadd.f32 %v2966_v40, %v2949_v27 }
 0x3af   : > { %v2810_v63 = vadd.f32 %v2789_v6, %v2668_v30  ;;  %v2953_v8 = vadd.f32 %v2933_v34, %v2811_v1  ;;  %v4829_v9 = vadd.f32 %v2966_v40, %v2948_v46  ;;  %v3103_v46 = vld [vmem:[%s4938_s7 + $0x20] sm:$0xf] }
 0x3b0   : > { %v2937_v3 = vpop.f32.mrf.mxu1 }
 0x3b1   : > { %v2954_v53 = vadd.f32 %v2937_v3, %v2812_v33  ;;  %v2667_v33 = vadd.f32 %v4970_v52, %v2525_v23  ;;  %v2666_v3 = vadd.f32 %v4971_v44, %v2524_v13  ;;  %v2952_v2 = vadd.f32 %v4794_v15, %v2810_v63  ;;  %v3107_v63 = vld [vmem:[%s4939_s8 + $0x18] sm:$0xff] }
 0x3b2   : > { %v2939_v26 = vpop.f32.mrf.mxu1  ;;  %v2998_v34 = vadd.f32 %v4820_v20, %v4829_v9  ;;  %v4845_v54 = vadd.f32 %v2976_v55, %v2953_v8 }
 0x3b3   : > { %v2955_v56 = vadd.f32 %v2939_v26, %v2813_v50  ;;  %v4813_v41 = vadd.f32 %v2981_v45, %v2954_v53  ;;  %v2809_v18 = vadd.f32 %v4791_v16, %v2667_v33  ;;  %v2808_v6 = vadd.f32 %v4778_v4, %v2666_v3 }
 0x3b4   : > { %v2943_v10 = vpop.f32.mrf.mxu1  ;;  %v4848_v15 = vadd.f32 %v2976_v55, %v2952_v2 }
 0x3b5   : > { %v4815_v31 = vadd.f32 %v2981_v45, %v2955_v56  ;;  %v2956_v12 = vadd.f32 %v2943_v10, %v2814_v49  ;;  %v2950_v16 = vadd.f32 %v4781_v51, %v2808_v6  ;;  %v3101_v10 = vld [vmem:[%s4938_s7 + $0x10] sm:$0xff] }
 0x3b6   : > { %v2945_v5 = vpop.f32.mrf.mxu1  ;;  %v3004_v62 = vadd.f32 %v4845_v54, %v4848_v15 }
 0x3b7   : > { %v4823_v0 = vadd.f32 %v4784_v21, %v2956_v12  ;;  %v2957_v48 = vadd.f32 %v2945_v5, %v2815_v38  ;;  %v3007_v28 = vadd.f32 %v4815_v31, %v4813_v41  ;;  %v4854_v37 = vadd.f32 %v2971_v22, %v2950_v16  ;;  %v3100_v38 = vld [vmem:[%s4938_s7 + $0x8] sm:$0xff]  ;;  %v3104_v12 = vld [vmem:[%s4939_s8] sm:$0xff] }
 0x3b9   : > { %v4832_v59 = vadd.f32 %v4784_v21, %v2957_v48  ;;  %3008 = vadd.xlane.f32.xlu1 %v3007_v28  ;;  %v3010_v50 = vsel %vm544_vm1, %v4823_v0, 0.0  ;;  %v2951_v21 = vadd.f32 %v4789_v17, %v2809_v18  ;;  %v4972_v17 = vmov 0.0   ;;  %v3106_v48 = vld [vmem:[%s4939_s8 + $0x10] sm:$0xff] }
 0x3ba   : > { %3489 = vmatprep.mubr.msk.f32.mxu0 %vm3581_vm12, %v4972_v17 }
 0x3bb   : > { %v3011_v53 = vsel %vm544_vm1, %v4832_v59, 0.0  ;;  %v4850_v24 = vadd.f32 %v2971_v22, %v2951_v21 }
 0x3bc   : > { %v3012_v58 = vadd.f32 %v3011_v53, %v3010_v50  ;;  %v3108_v50 = vld [vmem:[%s4939_s8 + $0x20] sm:$0xf] }
 0x3bd   : > { %2999 = vadd.xlane.f32.xlu1 %v2998_v34  ;;  %v3001_v4 = vadd.f32 %v4850_v24, %v4854_v37 }
 0x3be   : > { %3013 = vadd.xlane.f32.xlu0 %v3012_v58 }
 0x3c2   : > { %3005 = vadd.xlane.f32.xlu0 %v3004_v62 }
 0x3c6   : > { %3002 = vadd.xlane.f32.xlu0 %v3001_v4 }
 0x442   : > { %v3009_v51 = vpop.xlane.xlu1 %3008 }
 0x443   : > { %v3018_v26 = vmul.f32 0.00390625, %v3009_v51 }
 0x446   : > { %v3000_v19 = vpop.xlane.xlu1 %2999 }
 0x447   : > { %v3014_v55 = vpop.xlane.xlu0 %3013  ;;  %v3015_v45 = vmul.f32 0.00390625, %v3000_v19 }
 0x448   : > { %v3019_v36 = vmul.f32 0.00390625, %v3014_v55 }
 0x44a   : > { %3480 = vmatpush3.msk.msra.mxu0 %vm544_vm1, %v3019_v36 }
 0x44b   : > { %3481 = vmatprep.subr.mxu0 %v4972_v17  ;;  %v3006_v43 = vpop.xlane.xlu0 %3005 }
 0x44c   : > { %v3017_v49 = vmul.f32 0.00390625, %v3006_v43  ;;  %3482 = vmatpush3.msra.mxu0 %v3018_v26 }
 0x44d   : > { %3483 = vmatprep.subr.mxu0 %v4972_v17 }
 0x44e   : > { %3484 = vmatpush3.msra.mxu0 %v3017_v49 }
 0x44f   : > { %v3003_v27 = vpop.xlane.xlu0 %3002  ;;  %3485 = vmatprep.subr.mxu0 %v4972_v17 }
 0x450   : > { %v3016_v56 = vmul.f32 0.00390625, %v3003_v27 }
 0x452   : > { %3486 = vmatpush3.msra.mxu0 %v3016_v56 }
 0x453   : > { %3487 = vmatprep.subr.mxu0 %v4972_v17 }
 0x454   : > { %3488 = vmatpush3.msra.mxu0 %v3015_v45 }
 0x455   : > { %3490 = vmatmul.mubr.msk.f32.vlgmr.msra.gmra.mxu0 %vm537_vm3, %v3020_v32  ;;  %3492 = vmatprep.subr.mxu0 %v4972_v17 }
 0x456   : > { %3494 = vmatprep.mubr.msk.f32.mxu0 %vm3581_vm12, %v4972_v17 }
 0x515   : > { %v3094_v61 = vpop.f32.mrf.mxu0 }
 0x516   : > { %v3095_v35 = vadd.f32 %v3094_v61, %v3021_v29 }
 0x517   : > { %v3491_v42 = vpop.f32.mrf.mxu0 }
 0x518   : > { %v3098_v60 = vmax.f32 %v3095_v35, 0.0 }
 0x51a   : > { %3493 = vmatpush3.msk.msra.mxu0 %vm3125_vm13, %v3098_v60 }
 0x51b   : > { %3495 = vmatmul.mubr.msk.f32.vlgmr.msra.gmra.mxu0 %vm3109_vm14, %v3099_v39 }
 0x51c   : > { %3497 = vmatprep.mubr.msk.f32.mxu0 %vm3581_vm12, %v4972_v17 }
 0x51f   : > { %3498 = vmatmul.mubr.msk.f32.gmra.mxu0 %vm3109_vm14, %v3100_v38 }
 0x520   : > { %3500 = vmatprep.mubr.msk.f32.mxu0 %vm3581_vm12, %v4972_v17 }
 0x523   : > { %3501 = vmatmul.mubr.msk.f32.gmra.mxu0 %vm3109_vm14, %v3101_v10 }
 0x524   : > { %3503 = vmatprep.mubr.msk.f32.mxu0 %vm3581_vm12, %v4972_v17 }
 0x527   : > { %3504 = vmatmul.mubr.msk.f32.gmra.mxu0 %vm3109_vm14, %v3102_v11 }
 0x528   : > { %3506 = vmatprep.mubr.msk.f32.mxu0 %vm3581_vm12, %v4972_v17 }
 0x52b   : > { %3507 = vmatmul.mubr.msk.f32.gmra.mxu0 %vm3109_vm14, %v3103_v46 }
 0x5db   : > { %v3195_v40 = vpop.f32.mrf.mxu0 }
 0x5dc   : > { %v3196_v57 = vadd.f32 %v3195_v40, %v3104_v12 }
 0x5dd   : > { %v3496_v47 = vpop.f32.mrf.mxu0 }
 0x5de   : > { %v3219_v23 = vsub.f32 0.0, %v3196_v57 }
 0x5df   : > { %v3200_v25 = vpop.f32.mrf.mxu0 }
 0x5e0   : > { %v3224_v30 = vmul.f32 1.442695, %v3219_v23  ;;  %v3201_v1 = vadd.f32 %v3200_v25, %v3105_v14 }
 0x5e1   : > { %v3499_v5 = vpop.f32.mrf.mxu0 }
 0x5e2   : > { %3543 = vpow2.f32 %v3224_v30  ;;  %v3220_v28 = vsub.f32 0.0, %v3201_v1 }
 0x5e3   : > { %v3205_v7 = vpop.f32.mrf.mxu0 }
 0x5e4   : > { %v3226_v13 = vmul.f32 1.442695, %v3220_v28  ;;  %v3206_v52 = vadd.f32 %v3205_v7, %v3106_v48 }
 0x5e5   : > { %v3502_v33 = vpop.f32.mrf.mxu0 }
 0x5e6   : > { %3545 = vpow2.f32 %v3226_v13  ;;  %v3221_v8 = vsub.f32 0.0, %v3206_v52 }
 0x5e7   : > { %v3210_v44 = vpop.f32.mrf.mxu0 }
 0x5e8   : > { %v3228_v3 = vmul.f32 1.442695, %v3221_v8  ;;  %v3211_v18 = vadd.f32 %v3210_v44, %v3107_v63 }
 0x5e9   : > { %v3505_v2 = vpop.f32.mrf.mxu0 }
 0x5ea   : > { %3547 = vpow2.f32 %v3228_v3  ;;  %v3222_v53 = vsub.f32 0.0, %v3211_v18 }
 0x5eb   : > { %v3215_v34 = vpop.f32.mrf.mxu0 }
 0x5ec   : > { %v3230_v6 = vmul.f32 1.442695, %v3222_v53  ;;  %v3216_v21 = vadd.f32 %v3215_v34, %v3108_v50 }
 0x5ed   : > { %v3508_v58 = vpop.f32.mrf.mxu0 }
 0x5ee   : > { %3549 = vpow2.f32 %v3230_v6  ;;  %v3223_v16 = vsub.f32 0.0, %v3216_v21 }
 0x5ef   : > { %v3544_v22 = vpop.eup %3543 }
 0x5f0   : > { %v3234_v62 = vadd.f32 1.0, %v3544_v22  ;;  %v3232_v4 = vmul.f32 1.442695, %v3223_v16 }
 0x5f2   : > { %3551 = vrcp.f32 %v3234_v62 }
 0x5f3   : > { %v3546_v17 = vpop.eup %3545  ;;  %3553 = vpow2.f32 %v3232_v4 }
 0x5f4   : > { %v3235_v51 = vadd.f32 1.0, %v3546_v17 }
 0x5f6   : > { %3555 = vrcp.f32 %v3235_v51 }
 0x5f7   : > { %v3548_v55 = vpop.eup %3547 }
 0x5f8   : > { %v3236_v36 = vadd.f32 1.0, %v3548_v55 }
 0x5fa   : > { %3557 = vrcp.f32 %v3236_v36 }
 0x5fb   : > { %v3550_v26 = vpop.eup %3549 }
 0x5fc   : > { %v3237_v43 = vadd.f32 1.0, %v3550_v26 }
 0x5fe   : > { %3559 = vrcp.f32 %v3237_v43 }
 0x5ff   : > { %v3552_v49 = vpop.eup %3551 }
 0x600   : > { %v3554_v19 = vpop.eup %3553  ;;  %3251 = vperm.xlu0 %3533, %v3552_v49  }
 0x601   : > { %v3238_v27 = vadd.f32 1.0, %v3554_v19 }
 0x603   : > { %v3556_v56 = vpop.eup %3555  ;;  %3561 = vrcp.f32 %v3238_v27 }
 0x604   : > { %3256 = vperm.xlu1 %3534, %v3556_v56  }
 0x607   : > { %v3558_v45 = vpop.eup %3557 }
 0x608   : > { %3261 = vperm.xlu1 %3534, %v3558_v45  }
 0x60b   : > { %v3560_v32 = vpop.eup %3559 }
 0x60c   : > { %3266 = vperm.xlu0 %3533, %v3560_v32  }
 0x610   : > { %v3562_v29 = vpop.eup %3561 }
 0x611   : > { %3271 = vperm.xlu1 %3534, %v3562_v29  }
 0x67b   : > { %v3252_v61 = vpop.permute.xlu0 %3251 }
 0x67c   : > { %v3274_v35 = vmul.f32 %v3252_v61, %v4829_v9  ;;  %v3275_v42 = vmul.f32 %v3252_v61, %v4820_v20 }
 0x67e   : > { %3284 = vst [vmem:[%s359_s28] sm:$0xff] %v3274_v35  ;;  %3285 = vst [vmem:[%s359_s28 + $0x8] sm:$0xff] %v3275_v42 }
 0x67f   : > { %v3257_v60 = vpop.permute.xlu1 %3256 }
 0x680   : > { %v3276_v39 = vmul.f32 %v3257_v60, %v4854_v37  ;;  %v3277_v38 = vmul.f32 %v3257_v60, %v4850_v24 }
 0x682   : > { %3286 = vst [vmem:[%s359_s28 + $0x10] sm:$0xff] %v3276_v39  ;;  %3287 = vst [vmem:[%s359_s28 + $0x18] sm:$0xff] %v3277_v38 }
 0x683   : > { %v3262_v10 = vpop.permute.xlu1 %3261 }
 0x684   : > { %v3278_v11 = vmul.f32 %v3262_v10, %v4848_v15  ;;  %v3279_v46 = vmul.f32 %v3262_v10, %v4845_v54 }
 0x686   : > { %3288 = vst [vmem:[%s359_s28 + $0x20] sm:$0xff] %v3278_v11  ;;  %3289 = vst [vmem:[%s359_s28 + $0x28] sm:$0xff] %v3279_v46 }
 0x687   : > { %v3267_v12 = vpop.permute.xlu0 %3266 }
 0x688   : > { %v3280_v9 = vmul.f32 %v3267_v12, %v4813_v41  ;;  %v3281_v20 = vmul.f32 %v3267_v12, %v4815_v31 }
 0x68a   : > { %3290 = vst [vmem:[%s359_s28 + $0x30] sm:$0xff] %v3280_v9  ;;  %3291 = vst [vmem:[%s359_s28 + $0x38] sm:$0xff] %v3281_v20 }
 0x68c   : > { %v3272_v40 = vpop.permute.xlu1 %3271 }
 0x68d   : > { %v3282_v37 = vmul.f32 %v3272_v40, %v4823_v0  ;;  %v3283_v24 = vmul.f32 %v3272_v40, %v4832_v59 }
 0x68f   : > { %3292 = vst [vmem:[%s359_s28 + $0x40] sm:$0xf] %v3282_v37  ;;  %3293 = vst [vmem:[%s359_s28 + $0x48] sm:$0xf] %v3283_v24 }
 0x690 PF: > { %s20_s13 = sadd.s32 1, %s3569_s13  }
 0x691   : > { %p17_p4 = scmp.ge.s32.totalorder %s20_s13, 4  }
 0x693   :  { %19 = sbr.rel (!%p17_p4) target bundleno = 1 (0x1), region = 90 }

</bundles_post_ra>
